<compile_context>
chip_gen: v5e
topology: v5e:2x2
jax: 0.10.0
libtpu: 0.0.40
codegen_flags: <defaults>
</compile_context>

<pallas_src>
import functools

import jax
import jax.numpy as jnp
from jax.experimental import pallas as pl
from jax.experimental.pallas import tpu as pltpu


def _round_up(x, m):
    return (x + m - 1) // m * m


def _cdiv(a, b):
    return (a + b - 1) // b


# --------------------------------------------------------------------------------------
# Pallas kernels: tiled matmul with fused bias + optional residual-add + optional ReLU
# --------------------------------------------------------------------------------------
def _mm_kernel_acc(x_ref, w_ref, b_ref, *rest, relu, has_res):
    """Multi K-step variant: f32 VMEM accumulator, epilogue on last k."""
    if has_res:
        res_ref, o_ref, acc_ref = rest
    else:
        o_ref, acc_ref = rest

    k = pl.program_id(2)

    @pl.when(k == 0)
    def _():
        acc_ref[...] = jnp.zeros_like(acc_ref)

    acc_ref[...] += jnp.dot(x_ref[...], w_ref[...], preferred_element_type=jnp.float32)

    @pl.when(k == pl.num_programs(2) - 1)
    def _():
        out = acc_ref[...] + b_ref[...]
        if has_res:
            out = out + res_ref[...].astype(jnp.float32)
        if relu:
            out = jnp.maximum(out, 0.0)
        o_ref[...] = out.astype(o_ref.dtype)


def _mm_kernel_1k(x_ref, w_ref, b_ref, *rest, relu, has_res):
    """Single K-step fast path: no accumulator scratch, write the result directly."""
    if has_res:
        res_ref, o_ref = rest
    else:
        (o_ref,) = rest
    out = jnp.dot(x_ref[...], w_ref[...], preferred_element_type=jnp.float32)
    out = out + b_ref[...]
    if has_res:
        out = out + res_ref[...].astype(jnp.float32)
    if relu:
        out = jnp.maximum(out, 0.0)
    o_ref[...] = out.astype(o_ref.dtype)


def _pad2(a, rows, cols):
    r, c = a.shape
    if r == rows and c == cols:
        return a
    return jnp.pad(a, ((0, rows - r), (0, cols - c)))


def _buffered_spec(block_shape, index_map, depth=3):
    """Weight BlockSpec with a 3-deep pipeline when this jax version supports it."""
    try:
        return pl.BlockSpec(block_shape, index_map, pipeline_mode=pl.Buffered(depth))
    except Exception:  # older jax without pipeline_mode / Buffered
        return pl.BlockSpec(block_shape, index_map)


def _dense_jnp(x, w, b, relu, residual, out_dtype):
    """Plain-jnp fallback for tiny / heavily padded matmuls (XLA fuses these for free)."""
    out = jnp.dot(x, w.astype(x.dtype), preferred_element_type=jnp.float32)
    out = out + b.astype(jnp.float32)
    if residual is not None:
        out = out + residual.astype(jnp.float32)
    if relu:
        out = jnp.maximum(out, 0.0)
    return out.astype(out_dtype)


def pallas_linear(x, w, b, *, relu=False, residual=None, out_dtype=None):
    """y = act(x @ w + b [+ residual]) via a Pallas TPU matmul kernel (bf16 MXU, f32 acc)."""
    M, K = x.shape
    Kw, N = w.shape
    assert K == Kw
    out_dtype = out_dtype or x.dtype

    Mr, Kr, Nr = _round_up(M, 16), _round_up(K, 128), _round_up(N, 128)

    # Tiny or heavily padded matmuls: pad/slice HBM copies + per-step launch overhead
    # dwarf the real FLOPs -> route to plain jnp (late-stage M=2..8 tiles, fc heads).
    if M < 64 or Mr * Kr * Nr > 8 * M * K * N:
        return _dense_jnp(x, w, b, relu, residual, out_dtype)

    # Tile selection:
    #  * tn up to 512 (wide 1x1 convs): fills the 256-wide MXU, halves x re-reads.
    #  * tm up to 256: weight-DMA-bound at batch 2, fewer i-tiles = fewer weight streams.
    #  * single-K fast path up to K=2048; else tk = fewest k-steps, multiple of 128.
    tn = min(512, Nr)
    tm = min(256, Mr)
    if Kr <= 2048:
        tk, nk = Kr, 1
    else:
        nk = _cdiv(Kr, 2048)
        tk = _round_up(_cdiv(Kr, nk), 128)

    Mp, Np, Kp = _round_up(M, tm), _round_up(N, tn), nk * tk

    # Keep at least one 'parallel' grid axis with extent >= 2 (v7x has 2 TensorCores).
    if Mp // tm == 1 and Np // tn == 1 and Mr >= 32:
        tm = max(16, _round_up(_cdiv(Mr, 2), 16))
        Mp = _round_up(M, tm)

    xp = _pad2(x, Mp, Kp).astype(jnp.bfloat16)
    wp = _pad2(w, Kp, Np).astype(jnp.bfloat16)
    bp = _pad2(b.reshape(1, -1).astype(jnp.float32), 1, Np)

    has_res = residual is not None
    in_arrays = [xp, wp, bp]
    if has_res:
        in_arrays.append(_pad2(residual, Mp, Np).astype(jnp.bfloat16))

    if nk == 1:
        # 2-D grid (j leading so the parallel axis with extent >= 2 is outermost).
        grid = (Np // tn, Mp // tm)
        in_specs = [
            pl.BlockSpec((tm, tk), lambda j, i: (i, 0)),
            pl.BlockSpec((tk, tn), lambda j, i: (0, j)),
            pl.BlockSpec((1, tn), lambda j, i: (0, j)),
        ]
        if has_res:
            in_specs.append(pl.BlockSpec((tm, tn), lambda j, i: (i, j)))
        out_specs = pl.BlockSpec((tm, tn), lambda j, i: (i, j))
        kernel = functools.partial(_mm_kernel_1k, relu=relu, has_res=has_res)
        scratch = []
        dims = ("parallel", "parallel")
    else:
        grid = (Np // tn, Mp // tm, nk)
        in_specs = [
            pl.BlockSpec((tm, tk), lambda j, i, k: (i, k)),
            _buffered_spec((tk, tn), lambda j, i, k: (k, j)),  # 3-deep weight pipeline
            pl.BlockSpec((1, tn), lambda j, i, k: (0, j)),
        ]
        if has_res:
            in_specs.append(pl.BlockSpec((tm, tn), lambda j, i, k: (i, j)))
        out_specs = pl.BlockSpec((tm, tn), lambda j, i, k: (i, j))
        kernel = functools.partial(_mm_kernel_acc, relu=relu, has_res=has_res)
        scratch = [pltpu.VMEM((tm, tn), jnp.float32)]
        dims = ("parallel", "parallel", "arbitrary")

    out = pl.pallas_call(
        kernel,
        out_shape=jax.ShapeDtypeStruct((Mp, Np), out_dtype),
        grid_spec=pltpu.PrefetchScalarGridSpec(
            num_scalar_prefetch=0,
            grid=grid,
            in_specs=in_specs,
            out_specs=out_specs,
            scratch_shapes=scratch,
        ),
        compiler_params=pltpu.CompilerParams(dimension_semantics=dims),
    )(*in_arrays)

    if Mp == M and Np == N:
        return out
    # TODO(synk): keep channels padded to 128 between layers (zero weight rows in the
    # consumer) to avoid this slice + the next layer's re-pad HBM round-trips.
    return out[:M, :N]


# --------------------------------------------------------------------------------------
# Conv / pooling glue (data rearrangement only; matmul compute is in the Pallas kernel)
# --------------------------------------------------------------------------------------
def _im2col(x, kh, kw, stride, pad):
    # x: NHWC (bf16)
    n, h, w, c = x.shape
    xp = jnp.pad(x, ((0, 0), (pad, pad), (pad, pad), (0, 0)))
    ho = (h + 2 * pad - kh) // stride + 1
    wo = (w + 2 * pad - kw) // stride + 1
    cols = []
    for i in range(kh):
        for j in range(kw):
            cols.append(xp[:, i:i + stride * ho:stride, j:j + stride * wo:stride, :])
    patches = jnp.concatenate(cols, axis=-1)  # (N, Ho, Wo, kh*kw*C)
    return patches.reshape(n * ho * wo, kh * kw * c), n, ho, wo


def conv_bn(x, w, b, stride, pad, relu, residual2d=None):
    """Conv2d (bias folded from BN) via im2col + Pallas matmul. x: NHWC, w: (kh,kw,Cin,Cout)."""
    kh, kw, cin, cout = w.shape
    cols, n, ho, wo = _im2col(x, kh, kw, stride, pad)
    y = pallas_linear(cols, w.reshape(kh * kw * cin, cout), b,
                      relu=relu, residual=residual2d, out_dtype=jnp.bfloat16)
    return y.reshape(n, ho, wo, cout)


def maxpool2d(x, k=3, stride=2, pad=1):
    n, h, w, c = x.shape
    xp = jnp.pad(x, ((0, 0), (pad, pad), (pad, pad), (0, 0)),
                 constant_values=-jnp.inf)
    ho = (h + 2 * pad - k) // stride + 1
    wo = (w + 2 * pad - k) // stride + 1
    out = jnp.full((n, ho, wo, c), -jnp.inf, x.dtype)
    for i in range(k):
        for j in range(k):
            out = jnp.maximum(out, xp[:, i:i + stride * ho:stride,
                                      j:j + stride * wo:stride, :])
    return out


# --------------------------------------------------------------------------------------
# ResNet-50 structure (torchvision): conv1 replaced by a 1-input-channel conv,
# BN folded into conv weight/bias, fc replaced by Identity -> 2048 features.
# --------------------------------------------------------------------------------------
LAYER_CFG = [(64, 3, 1), (128, 4, 2), (256, 6, 2), (512, 3, 2)]  # (planes, n_blocks, stride)
EXPANSION = 4
NUM_FEATURES = 512 * EXPANSION  # 2048


class _KeyGen:
    def __init__(self, key):
        self.key = key

    def __call__(self):
        self.key, sub = jax.random.split(self.key)
        return sub


def _init_conv(kg, kh, kw, cin, cout):
    std = (2.0 / (kh * kw * cin)) ** 0.5
    w = (jax.random.normal(kg(), (kh, kw, cin, cout), jnp.float32) * std).astype(jnp.bfloat16)
    b = jnp.zeros((cout,), jnp.float32)
    return w, b


def _init_linear(kg, fan_in, fan_out, std_fan_in=None):
    std = (2.0 / (std_fan_in or fan_in)) ** 0.5
    w = jax.random.normal(kg(), (fan_in, fan_out), jnp.float32) * std
    b = jnp.zeros((fan_out,), jnp.float32)
    return w, b


def make_params(key, dense1, dense2, regressor):
    kg = _KeyGen(key)
    params = {}
    params["conv1_w"], params["conv1_b"] = _init_conv(kg, 7, 7, 1, 64)

    blocks = []
    strides = []
    in_ch = 64
    for planes, n_blocks, layer_stride in LAYER_CFG:
        for bi in range(n_blocks):
            s = layer_stride if bi == 0 else 1
            blk = {}
            blk["w1"], blk["b1"] = _init_conv(kg, 1, 1, in_ch, planes)
            blk["w2"], blk["b2"] = _init_conv(kg, 3, 3, planes, planes)
            blk["w3"], blk["b3"] = _init_conv(kg, 1, 1, planes, planes * EXPANSION)
            if s != 1 or in_ch != planes * EXPANSION:
                blk["wd"], blk["bd"] = _init_conv(kg, 1, 1, in_ch, planes * EXPANSION)
            blocks.append(blk)
            strides.append(s)
            in_ch = planes * EXPANSION
    params["blocks"] = blocks

    params["gd1_w"], params["gd1_b"] = _init_linear(kg, 1, dense1)
    params["gd2_w"], params["gd2_b"] = _init_linear(kg, dense1, dense2)
    # fc1 is split into an image-feature part and a gender part (no concat needed);
    # std matches the combined-fan-in init of the original single fc1.
    fc1_fan_in = dense2 + NUM_FEATURES
    params["fc1_w_img"], params["fc1_b"] = _init_linear(kg, NUM_FEATURES, regressor,
                                                        std_fan_in=fc1_fan_in)
    params["fc1_w_g"], _ = _init_linear(kg, dense2, regressor, std_fan_in=fc1_fan_in)
    params["fc2_w"], params["fc2_b"] = _init_linear(kg, regressor, 1)
    return params, tuple(strides)


def _bottleneck(x, p, stride):
    # identity / downsample path
    if "wd" in p:
        identity = conv_bn(x, p["wd"], p["bd"], stride, 0, relu=False)
    else:
        identity = x
    cout = p["w3"].shape[-1]

    out = conv_bn(x, p["w1"], p["b1"], 1, 0, relu=True)
    out = conv_bn(out, p["w2"], p["b2"], stride, 1, relu=True)
    # conv3 with residual add + final ReLU fused into the Pallas matmul epilogue
    res2d = identity.reshape(-1, cout)
    out = conv_bn(out, p["w3"], p["b3"], 1, 0, relu=True, residual2d=res2d)
    return out


def forward(params, img_nchw, gender, block_strides):
    # img_nchw: (N, 1, H, W) float32, gender: (N,) float32
    x = jnp.transpose(img_nchw, (0, 2, 3, 1)).astype(jnp.bfloat16)  # NCHW -> NHWC, bf16

    # ResNet-50 stem
    x = conv_bn(x, params["conv1_w"], params["conv1_b"], 2, 3, relu=True)
    x = maxpool2d(x, 3, 2, 1)

    # ResNet-50 stages
    for blk, s in zip(params["blocks"], block_strides):
        x = _bottleneck(x, blk, s)

    img_features = jnp.mean(x.astype(jnp.float32), axis=(1, 2))  # GAP -> (N, 2048), f32

    # gender_dense, fc1, fc2 are a few hundred FLOPs each at batch 2: plain jnp (XLA/VPU)
    # beats a padded-to-128 pallas_call launch here.  Dropout == identity at inference.
    g = gender.reshape(-1, 1).astype(jnp.float32)
    g = jax.nn.relu(g @ params["gd1_w"] + params["gd1_b"])
    g = jax.nn.relu(g @ params["gd2_w"] + params["gd2_b"])

    # fc1 without the concat: img_features @ W_img + g @ W_g + b  (same math as cat+fc1)
    h = img_features @ params["fc1_w_img"] + g @ params["fc1_w_g"] + params["fc1_b"]
    h = jax.nn.relu(h)
    out = h @ params["fc2_w"] + params["fc2_b"]
    return out  # (N, 1) f32


if __name__ == "__main__":
    DENSE1, DENSE2, REGRESSOR = 16, 8, 32  # dense_layer1_size, dense_layer2_size, regressor_layer_size
    # p_dropout is unused at inference (Dropout == identity)

    key = jax.random.PRNGKey(0)
    k_param, k_img, k_gender = jax.random.split(key, 3)

    params, block_strides = make_params(k_param, DENSE1, DENSE2, REGRESSOR)

    img = jax.random.normal(k_img, (2, 1, 32, 32), jnp.float32)           # NCHW, 1-channel
    gender = (jax.random.uniform(k_gender, (2,)) > 0.5).astype(jnp.float32)

    fwd = jax.jit(functools.partial(forward, block_strides=block_strides))
    out = fwd(params, img, gender)
    jax.block_until_ready(out)
    assert out.shape == (2, 1) and out.dtype == jnp.float32
    print("KERNEL_OK")
</pallas_src>

<mosaic_0001>
module attributes {stable_mosaic.version = 11 : i64} {
  func.func @_mm_kernel_1k(%arg0: i32, %arg1: i32, %arg2: memref<256x128xbf16, #tpu.memory_space<vmem>>, %arg3: memref<128x128xbf16, #tpu.memory_space<vmem>>, %arg4: memref<1x128xf32, #tpu.memory_space<vmem>>, %arg5: memref<256x128xbf16, #tpu.memory_space<vmem>>) attributes {dimension_semantics = [#tpu.dimension_semantics<parallel>, #tpu.dimension_semantics<parallel>], iteration_bounds = array<i64: 1, 2>, scalar_prefetch = 0 : i64, scratch_operands = 0 : i64, tpu.core_type = #tpu.core_type<tc>, window_params = [{transform_indices = @transform_0, window_bounds = array<i64: 256, 128>}, {transform_indices = @transform_1, window_bounds = array<i64: 128, 128>}, {transform_indices = @transform_2, window_bounds = array<i64: 1, 128>}, {transform_indices = @transform_3, window_bounds = array<i64: 256, 128>}]} {
    %c0 = arith.constant 0 : index
    %c0_0 = arith.constant 0 : index
    %0 = vector.load %arg2[%c0, %c0_0] : memref<256x128xbf16, #tpu.memory_space<vmem>>, vector<256x128xbf16>
    %c0_1 = arith.constant 0 : index
    %c0_2 = arith.constant 0 : index
    %1 = vector.load %arg3[%c0_1, %c0_2] : memref<128x128xbf16, #tpu.memory_space<vmem>>, vector<128x128xbf16>
    %cst = arith.constant dense<0.000000e+00> : vector<256x128xf32>
    %2 = tpu.matmul %0, %1, %cst {dimension_numbers = #tpu.dot_dimension_numbers<[1], [0], [0], [1], [0, 0, 1, 1], [], []>} : vector<256x128xbf16>, vector<128x128xbf16>, vector<256x128xf32> -> vector<256x128xf32>
    %c0_3 = arith.constant 0 : index
    %c0_4 = arith.constant 0 : index
    %3 = vector.load %arg4[%c0_3, %c0_4] : memref<1x128xf32, #tpu.memory_space<vmem>>, vector<1x128xf32>
    %4 = vector.broadcast %3 : vector<1x128xf32> to vector<256x128xf32>
    %5 = arith.addf %2, %4 : vector<256x128xf32>
    %cst_5 = arith.constant 0.000000e+00 : f32
    %6 = vector.broadcast %cst_5 : f32 to vector<256x128xf32>
    %7 = arith.maximumf %5, %6 : vector<256x128xf32>
    %8 = arith.truncf %7 : vector<256x128xf32> to vector<256x128xbf16>
    %c0_6 = arith.constant 0 : index
    %c0_7 = arith.constant 0 : index
    %9 = vector.load %arg5[%c0_6, %c0_7] : memref<256x128xbf16, #tpu.memory_space<vmem>>, vector<256x128xbf16>
    tpu.vector_store %arg5[%c0_6, %c0_7], %8 {strides = array<i32>} : memref<256x128xbf16, #tpu.memory_space<vmem>>, vector<256x128xbf16>,
    return
  }
  func.func @transform_0(%arg0: i32, %arg1: i32) -> (i32, i32) {
    %c0_i32 = arith.constant 0 : i32
    %c0_i32_0 = arith.constant 0 : i32
    return %arg1, %c0_i32 : i32, i32
  }
  func.func @transform_1(%arg0: i32, %arg1: i32) -> (i32, i32) {
    %c0_i32 = arith.constant 0 : i32
    %c0_i32_0 = arith.constant 0 : i32
    return %c0_i32, %arg0 : i32, i32
  }
  func.func @transform_2(%arg0: i32, %arg1: i32) -> (i32, i32) {
    %c0_i32 = arith.constant 0 : i32
    %c0_i32_0 = arith.constant 0 : i32
    return %c0_i32, %arg0 : i32, i32
  }
  func.func @transform_3(%arg0: i32, %arg1: i32) -> (i32, i32) {
    %c0_i32 = arith.constant 0 : i32
    return %arg1, %arg0 : i32, i32
  }
}

module attributes {stable_mosaic.version = 11 : i64} {
  func.func @_mm_kernel_1k(%arg0: i32, %arg1: i32, %arg2: memref<64x128xbf16, #tpu.memory_space<vmem>>, %arg3: memref<128x128xbf16, #tpu.memory_space<vmem>>, %arg4: memref<1x128xf32, #tpu.memory_space<vmem>>, %arg5: memref<64x128xbf16, #tpu.memory_space<vmem>>) attributes {dimension_semantics = [#tpu.dimension_semantics<parallel>, #tpu.dimension_semantics<parallel>], iteration_bounds = array<i64: 1, 2>, scalar_prefetch = 0 : i64, scratch_operands = 0 : i64, tpu.core_type = #tpu.core_type<tc>, window_params = [{transform_indices = @transform_0, window_bounds = array<i64: 64, 128>}, {transform_indices = @transform_1, window_bounds = array<i64: 128, 128>}, {transform_indices = @transform_2, window_bounds = array<i64: 1, 128>}, {transform_indices = @transform_3, window_bounds = array<i64: 64, 128>}]} {
    %c0 = arith.constant 0 : index
    %c0_0 = arith.constant 0 : index
    %0 = vector.load %arg2[%c0, %c0_0] : memref<64x128xbf16, #tpu.memory_space<vmem>>, vector<64x128xbf16>
    %c0_1 = arith.constant 0 : index
    %c0_2 = arith.constant 0 : index
    %1 = vector.load %arg3[%c0_1, %c0_2] : memref<128x128xbf16, #tpu.memory_space<vmem>>, vector<128x128xbf16>
    %cst = arith.constant dense<0.000000e+00> : vector<64x128xf32>
    %2 = tpu.matmul %0, %1, %cst {dimension_numbers = #tpu.dot_dimension_numbers<[1], [0], [0], [1], [0, 0, 1, 1], [], []>} : vector<64x128xbf16>, vector<128x128xbf16>, vector<64x128xf32> -> vector<64x128xf32>
    %c0_3 = arith.constant 0 : index
    %c0_4 = arith.constant 0 : index
    %3 = vector.load %arg4[%c0_3, %c0_4] : memref<1x128xf32, #tpu.memory_space<vmem>>, vector<1x128xf32>
    %4 = vector.broadcast %3 : vector<1x128xf32> to vector<64x128xf32>
    %5 = arith.addf %2, %4 : vector<64x128xf32>
    %cst_5 = arith.constant 0.000000e+00 : f32
    %6 = vector.broadcast %cst_5 : f32 to vector<64x128xf32>
    %7 = arith.maximumf %5, %6 : vector<64x128xf32>
    %8 = arith.truncf %7 : vector<64x128xf32> to vector<64x128xbf16>
    %c0_6 = arith.constant 0 : index
    %c0_7 = arith.constant 0 : index
    %9 = vector.load %arg5[%c0_6, %c0_7] : memref<64x128xbf16, #tpu.memory_space<vmem>>, vector<64x128xbf16>
    tpu.vector_store %arg5[%c0_6, %c0_7], %8 {strides = array<i32>} : memref<64x128xbf16, #tpu.memory_space<vmem>>, vector<64x128xbf16>,
    return
  }
  func.func @transform_0(%arg0: i32, %arg1: i32) -> (i32, i32) {
    %c0_i32 = arith.constant 0 : i32
    %c0_i32_0 = arith.constant 0 : i32
    return %arg1, %c0_i32 : i32, i32
  }
  func.func @transform_1(%arg0: i32, %arg1: i32) -> (i32, i32) {
    %c0_i32 = arith.constant 0 : i32
    %c0_i32_0 = arith.constant 0 : i32
    return %c0_i32, %arg0 : i32, i32
  }
  func.func @transform_2(%arg0: i32, %arg1: i32) -> (i32, i32) {
    %c0_i32 = arith.constant 0 : i32
    %c0_i32_0 = arith.constant 0 : i32
    return %c0_i32, %arg0 : i32, i32
  }
  func.func @transform_3(%arg0: i32, %arg1: i32) -> (i32, i32) {
    %c0_i32 = arith.constant 0 : i32
    return %arg1, %arg0 : i32, i32
  }
}

module attributes {stable_mosaic.version = 11 : i64} {
  func.func @_mm_kernel_1k(%arg0: i32, %arg1: i32, %arg2: memref<64x640xbf16, #tpu.memory_space<vmem>>, %arg3: memref<640x128xbf16, #tpu.memory_space<vmem>>, %arg4: memref<1x128xf32, #tpu.memory_space<vmem>>, %arg5: memref<64x128xbf16, #tpu.memory_space<vmem>>) attributes {dimension_semantics = [#tpu.dimension_semantics<parallel>, #tpu.dimension_semantics<parallel>], iteration_bounds = array<i64: 1, 2>, scalar_prefetch = 0 : i64, scratch_operands = 0 : i64, tpu.core_type = #tpu.core_type<tc>, window_params = [{transform_indices = @transform_0, window_bounds = array<i64: 64, 640>}, {transform_indices = @transform_1, window_bounds = array<i64: 640, 128>}, {transform_indices = @transform_2, window_bounds = array<i64: 1, 128>}, {transform_indices = @transform_3, window_bounds = array<i64: 64, 128>}]} {
    %c0 = arith.constant 0 : index
    %c0_0 = arith.constant 0 : index
    %0 = vector.load %arg2[%c0, %c0_0] : memref<64x640xbf16, #tpu.memory_space<vmem>>, vector<64x640xbf16>
    %c0_1 = arith.constant 0 : index
    %c0_2 = arith.constant 0 : index
    %1 = vector.load %arg3[%c0_1, %c0_2] : memref<640x128xbf16, #tpu.memory_space<vmem>>, vector<640x128xbf16>
    %cst = arith.constant dense<0.000000e+00> : vector<64x128xf32>
    %2 = tpu.matmul %0, %1, %cst {dimension_numbers = #tpu.dot_dimension_numbers<[1], [0], [0], [1], [0, 0, 1, 1], [], []>} : vector<64x640xbf16>, vector<640x128xbf16>, vector<64x128xf32> -> vector<64x128xf32>
    %c0_3 = arith.constant 0 : index
    %c0_4 = arith.constant 0 : index
    %3 = vector.load %arg4[%c0_3, %c0_4] : memref<1x128xf32, #tpu.memory_space<vmem>>, vector<1x128xf32>
    %4 = vector.broadcast %3 : vector<1x128xf32> to vector<64x128xf32>
    %5 = arith.addf %2, %4 : vector<64x128xf32>
    %cst_5 = arith.constant 0.000000e+00 : f32
    %6 = vector.broadcast %cst_5 : f32 to vector<64x128xf32>
    %7 = arith.maximumf %5, %6 : vector<64x128xf32>
    %8 = arith.truncf %7 : vector<64x128xf32> to vector<64x128xbf16>
    %c0_6 = arith.constant 0 : index
    %c0_7 = arith.constant 0 : index
    %9 = vector.load %arg5[%c0_6, %c0_7] : memref<64x128xbf16, #tpu.memory_space<vmem>>, vector<64x128xbf16>
    tpu.vector_store %arg5[%c0_6, %c0_7], %8 {strides = array<i32>} : memref<64x128xbf16, #tpu.memory_space<vmem>>, vector<64x128xbf16>,
    return
  }
  func.func @transform_0(%arg0: i32, %arg1: i32) -> (i32, i32) {
    %c0_i32 = arith.constant 0 : i32
    %c0_i32_0 = arith.constant 0 : i32
    return %arg1, %c0_i32 : i32, i32
  }
  func.func @transform_1(%arg0: i32, %arg1: i32) -> (i32, i32) {
    %c0_i32 = arith.constant 0 : i32
    %c0_i32_0 = arith.constant 0 : i32
    return %c0_i32, %arg0 : i32, i32
  }
  func.func @transform_2(%arg0: i32, %arg1: i32) -> (i32, i32) {
    %c0_i32 = arith.constant 0 : i32
    %c0_i32_0 = arith.constant 0 : i32
    return %c0_i32, %arg0 : i32, i32
  }
  func.func @transform_3(%arg0: i32, %arg1: i32) -> (i32, i32) {
    %c0_i32 = arith.constant 0 : i32
    return %arg1, %arg0 : i32, i32
  }
}

module attributes {stable_mosaic.version = 11 : i64} {
  func.func @_mm_kernel_1k(%arg0: i32, %arg1: i32, %arg2: memref<64x128xbf16, #tpu.memory_space<vmem>>, %arg3: memref<128x256xbf16, #tpu.memory_space<vmem>>, %arg4: memref<1x256xf32, #tpu.memory_space<vmem>>, %arg5: memref<64x256xbf16, #tpu.memory_space<vmem>>) attributes {dimension_semantics = [#tpu.dimension_semantics<parallel>, #tpu.dimension_semantics<parallel>], iteration_bounds = array<i64: 1, 2>, scalar_prefetch = 0 : i64, scratch_operands = 0 : i64, tpu.core_type = #tpu.core_type<tc>, window_params = [{transform_indices = @transform_0, window_bounds = array<i64: 64, 128>}, {transform_indices = @transform_1, window_bounds = array<i64: 128, 256>}, {transform_indices = @transform_2, window_bounds = array<i64: 1, 256>}, {transform_indices = @transform_3, window_bounds = array<i64: 64, 256>}]} {
    %c0 = arith.constant 0 : index
    %c0_0 = arith.constant 0 : index
    %0 = vector.load %arg2[%c0, %c0_0] : memref<64x128xbf16, #tpu.memory_space<vmem>>, vector<64x128xbf16>
    %c0_1 = arith.constant 0 : index
    %c0_2 = arith.constant 0 : index
    %1 = vector.load %arg3[%c0_1, %c0_2] : memref<128x256xbf16, #tpu.memory_space<vmem>>, vector<128x256xbf16>
    %cst = arith.constant dense<0.000000e+00> : vector<64x256xf32>
    %2 = tpu.matmul %0, %1, %cst {dimension_numbers = #tpu.dot_dimension_numbers<[1], [0], [0], [1], [0, 0, 1, 1], [], []>} : vector<64x128xbf16>, vector<128x256xbf16>, vector<64x256xf32> -> vector<64x256xf32>
    %c0_3 = arith.constant 0 : index
    %c0_4 = arith.constant 0 : index
    %3 = vector.load %arg4[%c0_3, %c0_4] : memref<1x256xf32, #tpu.memory_space<vmem>>, vector<1x256xf32>
    %4 = vector.broadcast %3 : vector<1x256xf32> to vector<64x256xf32>
    %5 = arith.addf %2, %4 : vector<64x256xf32>
    %6 = arith.truncf %5 : vector<64x256xf32> to vector<64x256xbf16>
    %c0_5 = arith.constant 0 : index
    %c0_6 = arith.constant 0 : index
    %7 = vector.load %arg5[%c0_5, %c0_6] : memref<64x256xbf16, #tpu.memory_space<vmem>>, vector<64x256xbf16>
    tpu.vector_store %arg5[%c0_5, %c0_6], %6 {strides = array<i32>} : memref<64x256xbf16, #tpu.memory_space<vmem>>, vector<64x256xbf16>,
    return
  }
  func.func @transform_0(%arg0: i32, %arg1: i32) -> (i32, i32) {
    %c0_i32 = arith.constant 0 : i32
    %c0_i32_0 = arith.constant 0 : i32
    return %arg1, %c0_i32 : i32, i32
  }
  func.func @transform_1(%arg0: i32, %arg1: i32) -> (i32, i32) {
    %c0_i32 = arith.constant 0 : i32
    %c0_i32_0 = arith.constant 0 : i32
    return %c0_i32, %arg0 : i32, i32
  }
  func.func @transform_2(%arg0: i32, %arg1: i32) -> (i32, i32) {
    %c0_i32 = arith.constant 0 : i32
    %c0_i32_0 = arith.constant 0 : i32
    return %c0_i32, %arg0 : i32, i32
  }
  func.func @transform_3(%arg0: i32, %arg1: i32) -> (i32, i32) {
    %c0_i32 = arith.constant 0 : i32
    return %arg1, %arg0 : i32, i32
  }
}

module attributes {stable_mosaic.version = 11 : i64} {
  func.func @_mm_kernel_1k(%arg0: i32, %arg1: i32, %arg2: memref<64x128xbf16, #tpu.memory_space<vmem>>, %arg3: memref<128x256xbf16, #tpu.memory_space<vmem>>, %arg4: memref<1x256xf32, #tpu.memory_space<vmem>>, %arg5: memref<64x256xbf16, #tpu.memory_space<vmem>>, %arg6: memref<64x256xbf16, #tpu.memory_space<vmem>>) attributes {dimension_semantics = [#tpu.dimension_semantics<parallel>, #tpu.dimension_semantics<parallel>], iteration_bounds = array<i64: 1, 2>, scalar_prefetch = 0 : i64, scratch_operands = 0 : i64, tpu.core_type = #tpu.core_type<tc>, window_params = [{transform_indices = @transform_0, window_bounds = array<i64: 64, 128>}, {transform_indices = @transform_1, window_bounds = array<i64: 128, 256>}, {transform_indices = @transform_2, window_bounds = array<i64: 1, 256>}, {transform_indices = @transform_3, window_bounds = array<i64: 64, 256>}, {transform_indices = @transform_4, window_bounds = array<i64: 64, 256>}]} {
    %c0 = arith.constant 0 : index
    %c0_0 = arith.constant 0 : index
    %0 = vector.load %arg2[%c0, %c0_0] : memref<64x128xbf16, #tpu.memory_space<vmem>>, vector<64x128xbf16>
    %c0_1 = arith.constant 0 : index
    %c0_2 = arith.constant 0 : index
    %1 = vector.load %arg3[%c0_1, %c0_2] : memref<128x256xbf16, #tpu.memory_space<vmem>>, vector<128x256xbf16>
    %cst = arith.constant dense<0.000000e+00> : vector<64x256xf32>
    %2 = tpu.matmul %0, %1, %cst {dimension_numbers = #tpu.dot_dimension_numbers<[1], [0], [0], [1], [0, 0, 1, 1], [], []>} : vector<64x128xbf16>, vector<128x256xbf16>, vector<64x256xf32> -> vector<64x256xf32>
    %c0_3 = arith.constant 0 : index
    %c0_4 = arith.constant 0 : index
    %3 = vector.load %arg4[%c0_3, %c0_4] : memref<1x256xf32, #tpu.memory_space<vmem>>, vector<1x256xf32>
    %4 = vector.broadcast %3 : vector<1x256xf32> to vector<64x256xf32>
    %5 = arith.addf %2, %4 : vector<64x256xf32>
    %c0_5 = arith.constant 0 : index
    %c0_6 = arith.constant 0 : index
    %6 = vector.load %arg5[%c0_5, %c0_6] : memref<64x256xbf16, #tpu.memory_space<vmem>>, vector<64x256xbf16>
    %7 = arith.extf %6 : vector<64x256xbf16> to vector<64x256xf32>
    %8 = arith.addf %5, %7 : vector<64x256xf32>
    %cst_7 = arith.constant 0.000000e+00 : f32
    %9 = vector.broadcast %cst_7 : f32 to vector<64x256xf32>
    %10 = arith.maximumf %8, %9 : vector<64x256xf32>
    %11 = arith.truncf %10 : vector<64x256xf32> to vector<64x256xbf16>
    %c0_8 = arith.constant 0 : index
    %c0_9 = arith.constant 0 : index
    %12 = vector.load %arg6[%c0_8, %c0_9] : memref<64x256xbf16, #tpu.memory_space<vmem>>, vector<64x256xbf16>
    tpu.vector_store %arg6[%c0_8, %c0_9], %11 {strides = array<i32>} : memref<64x256xbf16, #tpu.memory_space<vmem>>, vector<64x256xbf16>,
    return
  }
  func.func @transform_0(%arg0: i32, %arg1: i32) -> (i32, i32) {
    %c0_i32 = arith.constant 0 : i32
    %c0_i32_0 = arith.constant 0 : i32
    return %arg1, %c0_i32 : i32, i32
  }
  func.func @transform_1(%arg0: i32, %arg1: i32) -> (i32, i32) {
    %c0_i32 = arith.constant 0 : i32
    %c0_i32_0 = arith.constant 0 : i32
    return %c0_i32, %arg0 : i32, i32
  }
  func.func @transform_2(%arg0: i32, %arg1: i32) -> (i32, i32) {
    %c0_i32 = arith.constant 0 : i32
    %c0_i32_0 = arith.constant 0 : i32
    return %c0_i32, %arg0 : i32, i32
  }
  func.func @transform_3(%arg0: i32, %arg1: i32) -> (i32, i32) {
    %c0_i32 = arith.constant 0 : i32
    return %arg1, %arg0 : i32, i32
  }
  func.func @transform_4(%arg0: i32, %arg1: i32) -> (i32, i32) {
    %c0_i32 = arith.constant 0 : i32
    return %arg1, %arg0 : i32, i32
  }
}

module attributes {stable_mosaic.version = 11 : i64} {
  func.func @_mm_kernel_1k(%arg0: i32, %arg1: i32, %arg2: memref<64x256xbf16, #tpu.memory_space<vmem>>, %arg3: memref<256x128xbf16, #tpu.memory_space<vmem>>, %arg4: memref<1x128xf32, #tpu.memory_space<vmem>>, %arg5: memref<64x128xbf16, #tpu.memory_space<vmem>>) attributes {dimension_semantics = [#tpu.dimension_semantics<parallel>, #tpu.dimension_semantics<parallel>], iteration_bounds = array<i64: 1, 2>, scalar_prefetch = 0 : i64, scratch_operands = 0 : i64, tpu.core_type = #tpu.core_type<tc>, window_params = [{transform_indices = @transform_0, window_bounds = array<i64: 64, 256>}, {transform_indices = @transform_1, window_bounds = array<i64: 256, 128>}, {transform_indices = @transform_2, window_bounds = array<i64: 1, 128>}, {transform_indices = @transform_3, window_bounds = array<i64: 64, 128>}]} {
    %c0 = arith.constant 0 : index
    %c0_0 = arith.constant 0 : index
    %0 = vector.load %arg2[%c0, %c0_0] : memref<64x256xbf16, #tpu.memory_space<vmem>>, vector<64x256xbf16>
    %c0_1 = arith.constant 0 : index
    %c0_2 = arith.constant 0 : index
    %1 = vector.load %arg3[%c0_1, %c0_2] : memref<256x128xbf16, #tpu.memory_space<vmem>>, vector<256x128xbf16>
    %cst = arith.constant dense<0.000000e+00> : vector<64x128xf32>
    %2 = tpu.matmul %0, %1, %cst {dimension_numbers = #tpu.dot_dimension_numbers<[1], [0], [0], [1], [0, 0, 1, 1], [], []>} : vector<64x256xbf16>, vector<256x128xbf16>, vector<64x128xf32> -> vector<64x128xf32>
    %c0_3 = arith.constant 0 : index
    %c0_4 = arith.constant 0 : index
    %3 = vector.load %arg4[%c0_3, %c0_4] : memref<1x128xf32, #tpu.memory_space<vmem>>, vector<1x128xf32>
    %4 = vector.broadcast %3 : vector<1x128xf32> to vector<64x128xf32>
    %5 = arith.addf %2, %4 : vector<64x128xf32>
    %cst_5 = arith.constant 0.000000e+00 : f32
    %6 = vector.broadcast %cst_5 : f32 to vector<64x128xf32>
    %7 = arith.maximumf %5, %6 : vector<64x128xf32>
    %8 = arith.truncf %7 : vector<64x128xf32> to vector<64x128xbf16>
    %c0_6 = arith.constant 0 : index
    %c0_7 = arith.constant 0 : index
    %9 = vector.load %arg5[%c0_6, %c0_7] : memref<64x128xbf16, #tpu.memory_space<vmem>>, vector<64x128xbf16>
    tpu.vector_store %arg5[%c0_6, %c0_7], %8 {strides = array<i32>} : memref<64x128xbf16, #tpu.memory_space<vmem>>, vector<64x128xbf16>,
    return
  }
  func.func @transform_0(%arg0: i32, %arg1: i32) -> (i32, i32) {
    %c0_i32 = arith.constant 0 : i32
    %c0_i32_0 = arith.constant 0 : i32
    return %arg1, %c0_i32 : i32, i32
  }
  func.func @transform_1(%arg0: i32, %arg1: i32) -> (i32, i32) {
    %c0_i32 = arith.constant 0 : i32
    %c0_i32_0 = arith.constant 0 : i32
    return %c0_i32, %arg0 : i32, i32
  }
  func.func @transform_2(%arg0: i32, %arg1: i32) -> (i32, i32) {
    %c0_i32 = arith.constant 0 : i32
    %c0_i32_0 = arith.constant 0 : i32
    return %c0_i32, %arg0 : i32, i32
  }
  func.func @transform_3(%arg0: i32, %arg1: i32) -> (i32, i32) {
    %c0_i32 = arith.constant 0 : i32
    return %arg1, %arg0 : i32, i32
  }
}

</mosaic_0001>

<bundles_post_ra>
// kernel: forward.12
= control target key start
LH: loop header
LB: loop body
LE: loop exit
PB: predicated region body
PF: predicated region fallthrough
CT: control target
= control target key end

     0   :  { %s1029_s12 = smov 0   ;;  %s1031_s13 = smov 0   ;;  %s1169_s0 = inlined_call_operand.vmem [shape: bf16[512,128], index: 0, kind: input, shape index: {}]   ;;  %s1170_s1 = inlined_call_operand.vmem [shape: bf16[128,128], index: 1, kind: input, shape index: {}]   ;;  %s1171_s2 = inlined_call_operand.vmem [shape: f32[1,128], index: 2, kind: input, shape index: {}]   ;;  %s1172_s3 = inlined_call_operand.vmem [shape: bf16[512,128], index: 3, kind: output, shape index: {}]  }
   0x1   :  { %s1033_s14 = smov 0  }
   0x2 LB: > { %s22_s15 = sadd.s32 1, %s1003_s13  ;;  %p714_p0 = scmp.ge.s32.totalorder %s1007_s14, 1  ;;  %s1007_s14 = sphi %s1033_s14, %s13_s14   ;;  %s1003_s13 = sphi %s1031_s13, %s1174_s13   ;;  %s999_s12 = sphi %s1029_s12, %s1173_s12  }
   0x3   : > { %p23_p1 = scmp.ge.s32.totalorder %s22_s15, 2  ;;  %p169_p2 = scmp.lt.s32.totalorder %s1007_s14, 3 }
   0x5   : > { %s1176_s15 = smov (%p23_p1, %s22_s15), 0  ;;  %p170_p3 = pnand %p714_p0, %p169_p2 }
   0x6   : > { %s715_s24 = sshll.u32 (!%p170_p3), %s999_s12, 5 }
   0x7   : > { %173 = sbr.rel (%p170_p3) target bundleno = 241 (0xf1), region = 32  ;;  %p204_p4 = scmp.lt.s32.totalorder (!%p170_p3), %s715_s24, 63 }
   0xc   : > { %v840_v0 = vld [vmem:[%s1170_s1 + $0x38] sm:$0xff]  ;;  %v839_v1 = vld [vmem:[%s1170_s1 + $0x30] sm:$0xff]  ;;  %v838_v2 = vld [vmem:[%s1170_s1 + $0x28] sm:$0xff]  ;;  %s1178_s24 = smov (!%p204_p4, %s715_s24), 63 }
   0xd   : > { %421 = vmatpush.bf16.msra.mxu0 %v840_v0  ;;  %936 = vmatpush.bf16.msra.mxu1 %v840_v0  ;;  %v837_v3 = vld [vmem:[%s1170_s1 + $0x20] sm:$0xff]  ;;  %v836_v4 = vld [vmem:[%s1170_s1 + $0x18] sm:$0xff]  ;;  %v835_v5 = vld [vmem:[%s1170_s1 + $0x10] sm:$0xff]  ;;  %s716_s4 = sshll.u32 %s1178_s24, 2 }
   0xe   : > { %937 = vmatpush.bf16.msra.mxu2 %v840_v0  ;;  %938 = vmatpush.bf16.msra.mxu3 %v840_v0  ;;  %v834_v6 = vld [vmem:[%s1170_s1 + $0x8] sm:$0xff]  ;;  %v833_v7 = vld [vmem:[%s1170_s1] sm:$0xff]  ;;  %s1082_s9 = scalar_lea.vmem %s1169_s0, %s716_s4  ;;  %s1114_s17 = scalar_lea.vmem %s1172_s3, %s716_s4 }
   0xf   : > { %v817_v8 = vld [vmem:[%s1082_s9] sm:$0xff]  ;;  %v818_v12 = vld [vmem:[%s1082_s9 + $0x8] sm:$0xff]  ;;  %v819_v16 = vld [vmem:[%s1082_s9 + $0x10] sm:$0xff] }
  0x10   : > { %v821_v9 = vld [vmem:[%s1082_s9 + $0x20] sm:$0xff]  ;;  %v822_v13 = vld [vmem:[%s1082_s9 + $0x28] sm:$0xff]  ;;  %v823_v17 = vld [vmem:[%s1082_s9 + $0x30] sm:$0xff] }
  0x11   : > { %422 = vmatpush.bf16.msra.mxu0 %v839_v1  ;;  %939 = vmatpush.bf16.msra.mxu1 %v839_v1  ;;  %v825_v10 = vld [vmem:[%s1082_s9 + $0x40] sm:$0xff]  ;;  %v826_v14 = vld [vmem:[%s1082_s9 + $0x48] sm:$0xff]  ;;  %v827_v18 = vld [vmem:[%s1082_s9 + $0x50] sm:$0xff] }
  0x12   : > { %940 = vmatpush.bf16.msra.mxu2 %v839_v1  ;;  %941 = vmatpush.bf16.msra.mxu3 %v839_v1  ;;  %v829_v11 = vld [vmem:[%s1082_s9 + $0x60] sm:$0xff]  ;;  %v830_v15 = vld [vmem:[%s1082_s9 + $0x68] sm:$0xff]  ;;  %v831_v19 = vld [vmem:[%s1082_s9 + $0x70] sm:$0xff] }
  0x13   : > { %v820_v20 = vld [vmem:[%s1082_s9 + $0x18] sm:$0xff]  ;;  %v1103_v26 = vld [vmem:[%s1171_s2] ss:$0 sm:$0xff] }
  0x14   : > { %v824_v21 = vld [vmem:[%s1082_s9 + $0x38] sm:$0xff] }
  0x15   : > { %423 = vmatpush.bf16.msra.mxu0 %v838_v2  ;;  %942 = vmatpush.bf16.msra.mxu1 %v838_v2  ;;  %v828_v22 = vld [vmem:[%s1082_s9 + $0x58] sm:$0xff] }
  0x16   : > { %943 = vmatpush.bf16.msra.mxu2 %v838_v2  ;;  %944 = vmatpush.bf16.msra.mxu3 %v838_v2  ;;  %v832_v23 = vld [vmem:[%s1082_s9 + $0x78] sm:$0xff] }
  0x19   : > { %424 = vmatpush.bf16.msra.mxu0 %v837_v3  ;;  %945 = vmatpush.bf16.msra.mxu1 %v837_v3 }
  0x1a   : > { %946 = vmatpush.bf16.msra.mxu2 %v837_v3  ;;  %947 = vmatpush.bf16.msra.mxu3 %v837_v3 }
  0x1d   : > { %425 = vmatpush.bf16.msra.mxu0 %v836_v4  ;;  %948 = vmatpush.bf16.msra.mxu1 %v836_v4 }
  0x1e   : > { %949 = vmatpush.bf16.msra.mxu2 %v836_v4  ;;  %950 = vmatpush.bf16.msra.mxu3 %v836_v4 }
  0x21   : > { %426 = vmatpush.bf16.msra.mxu0 %v835_v5  ;;  %951 = vmatpush.bf16.msra.mxu1 %v835_v5 }
  0x22   : > { %952 = vmatpush.bf16.msra.mxu2 %v835_v5  ;;  %953 = vmatpush.bf16.msra.mxu3 %v835_v5 }
  0x25   : > { %427 = vmatpush.bf16.msra.mxu0 %v834_v6  ;;  %954 = vmatpush.bf16.msra.mxu1 %v834_v6 }
  0x26   : > { %955 = vmatpush.bf16.msra.mxu2 %v834_v6  ;;  %956 = vmatpush.bf16.msra.mxu3 %v834_v6 }
  0x29   : > { %428 = vmatpush.bf16.msra.mxu0 %v833_v7  ;;  %957 = vmatpush.bf16.msra.mxu1 %v833_v7 }
  0x2a   : > { %958 = vmatpush.bf16.msra.mxu2 %v833_v7  ;;  %959 = vmatpush.bf16.msra.mxu3 %v833_v7 }
  0x2c   : > { %429 = vmatmul.bf16.vlgmr.msra.gmra.mxu0 %v817_v8  ;;  %449 = vmatmul.bf16.vlgmr.msra.gmra.mxu1 %v821_v9 }
  0x2d   : > { %469 = vmatmul.bf16.vlgmr.msra.gmra.mxu2 %v825_v10  ;;  %489 = vmatmul.bf16.vlgmr.msra.gmra.mxu3 %v829_v11 }
  0x3c   : > { %434 = vmatmul.bf16.gmra.mxu0 %v818_v12  ;;  %454 = vmatmul.bf16.gmra.mxu1 %v822_v13 }
  0x3d   : > { %474 = vmatmul.bf16.gmra.mxu2 %v826_v14  ;;  %494 = vmatmul.bf16.gmra.mxu3 %v830_v15 }
  0x4c   : > { %439 = vmatmul.bf16.gmra.mxu0 %v819_v16  ;;  %459 = vmatmul.bf16.gmra.mxu1 %v823_v17 }
  0x4d   : > { %479 = vmatmul.bf16.gmra.mxu2 %v827_v18  ;;  %499 = vmatmul.bf16.gmra.mxu3 %v831_v19 }
  0x5c   : > { %444 = vmatmul.bf16.gmra.mxu0 %v820_v20  ;;  %464 = vmatmul.bf16.gmra.mxu1 %v824_v21 }
  0x5d   : > { %484 = vmatmul.bf16.gmra.mxu2 %v828_v22  ;;  %504 = vmatmul.bf16.gmra.mxu3 %v832_v23 }
  0xa9   : > { %v430_v24 = vpop.f32.mrf.mxu0  ;;  %v450_v25 = vpop.f32.mrf.mxu1 }
  0xaa   : > { %v431_v27 = vadd.f32 %v1103_v26, %v430_v24  ;;  %v451_v28 = vadd.f32 %v1103_v26, %v450_v25 }
  0xac   : > { %v510_v35 = vmax.f32 %v431_v27, 0.0  ;;  %v518_v36 = vmax.f32 %v451_v28, 0.0 }
  0xb0   : > { %v470_v29 = vpop.f32.mrf.mxu2  ;;  %v490_v30 = vpop.f32.mrf.mxu3 }
  0xb1   : > { %v432_v31 = vpop.f32.mrf.mxu0  ;;  %v452_v32 = vpop.f32.mrf.mxu1  ;;  %v471_v41 = vadd.f32 %v1103_v26, %v470_v29  ;;  %v491_v42 = vadd.f32 %v1103_v26, %v490_v30 }
  0xb2   : > { %v433_v33 = vadd.f32 %v1103_v26, %v432_v31  ;;  %v453_v34 = vadd.f32 %v1103_v26, %v452_v32 }
  0xb3   : > { %v526_v49 = vmax.f32 %v471_v41, 0.0  ;;  %v534_v50 = vmax.f32 %v491_v42, 0.0 }
  0xb4   : > { %v511_v37 = vmax.f32 %v433_v33, 0.0  ;;  %v519_v38 = vmax.f32 %v453_v34, 0.0 }
  0xb6   : > { %v844_v39 = vpack.c.bf16 %v511_v37, %v510_v35  ;;  %v864_v40 = vpack.c.bf16 %v519_v38, %v518_v36 }
  0xb8   : > { %845 = vst [vmem:[%s1114_s17] sm:$0xff] %v844_v39   ;;  %v472_v43 = vpop.f32.mrf.mxu2  ;;  %v492_v44 = vpop.f32.mrf.mxu3 }
  0xb9   : > { %924 = vst [vmem:[%s1114_s17 + $0x20] sm:$0xff] %v864_v40   ;;  %v473_v45 = vadd.f32 %v1103_v26, %v472_v43  ;;  %v493_v46 = vadd.f32 %v1103_v26, %v492_v44  ;;  %v435_v47 = vpop.f32.mrf.mxu0  ;;  %v455_v48 = vpop.f32.mrf.mxu1 }
  0xba   : > { %v436_v55 = vadd.f32 %v1103_v26, %v435_v47  ;;  %v456_v56 = vadd.f32 %v1103_v26, %v455_v48 }
  0xbb   : > { %v527_v51 = vmax.f32 %v473_v45, 0.0  ;;  %v535_v52 = vmax.f32 %v493_v46, 0.0 }
  0xbc   : > { %v512_v63 = vmax.f32 %v436_v55, 0.0  ;;  %v520_v0 = vmax.f32 %v456_v56, 0.0 }
  0xbd   : > { %v884_v53 = vpack.c.bf16 %v527_v51, %v526_v49  ;;  %v904_v54 = vpack.c.bf16 %v535_v52, %v534_v50 }
  0xbf   : > { %928 = vst [vmem:[%s1114_s17 + $0x40] sm:$0xff] %v884_v53  }
  0xc0   : > { %932 = vst [vmem:[%s1114_s17 + $0x60] sm:$0xff] %v904_v54   ;;  %v475_v57 = vpop.f32.mrf.mxu2  ;;  %v495_v58 = vpop.f32.mrf.mxu3 }
  0xc1   : > { %v437_v59 = vpop.f32.mrf.mxu0  ;;  %v457_v60 = vpop.f32.mrf.mxu1  ;;  %v476_v5 = vadd.f32 %v1103_v26, %v475_v57  ;;  %v496_v6 = vadd.f32 %v1103_v26, %v495_v58 }
  0xc2   : > { %v438_v61 = vadd.f32 %v1103_v26, %v437_v59  ;;  %v458_v62 = vadd.f32 %v1103_v26, %v457_v60 }
  0xc3   : > { %v528_v13 = vmax.f32 %v476_v5, 0.0  ;;  %v536_v14 = vmax.f32 %v496_v6, 0.0 }
  0xc4   : > { %v513_v1 = vmax.f32 %v438_v61, 0.0  ;;  %v521_v2 = vmax.f32 %v458_v62, 0.0 }
  0xc6   : > { %v849_v3 = vpack.c.bf16 %v513_v1, %v512_v63  ;;  %v869_v4 = vpack.c.bf16 %v521_v2, %v520_v0 }
  0xc8   : > { %921 = vst [vmem:[%s1114_s17 + $0x8] sm:$0xff] %v849_v3   ;;  %v477_v7 = vpop.f32.mrf.mxu2  ;;  %v497_v8 = vpop.f32.mrf.mxu3 }
  0xc9   : > { %925 = vst [vmem:[%s1114_s17 + $0x28] sm:$0xff] %v869_v4   ;;  %v478_v9 = vadd.f32 %v1103_v26, %v477_v7  ;;  %v498_v10 = vadd.f32 %v1103_v26, %v497_v8  ;;  %v440_v11 = vpop.f32.mrf.mxu0  ;;  %v460_v12 = vpop.f32.mrf.mxu1 }
  0xca   : > { %v441_v19 = vadd.f32 %v1103_v26, %v440_v11  ;;  %v461_v20 = vadd.f32 %v1103_v26, %v460_v12 }
  0xcb   : > { %v529_v15 = vmax.f32 %v478_v9, 0.0  ;;  %v537_v16 = vmax.f32 %v498_v10, 0.0 }
  0xcc   : > { %v514_v28 = vmax.f32 %v441_v19, 0.0  ;;  %v522_v29 = vmax.f32 %v461_v20, 0.0 }
  0xcd   : > { %v889_v17 = vpack.c.bf16 %v529_v15, %v528_v13  ;;  %v909_v18 = vpack.c.bf16 %v537_v16, %v536_v14 }
  0xcf   : > { %929 = vst [vmem:[%s1114_s17 + $0x48] sm:$0xff] %v889_v17  }
  0xd0   : > { %933 = vst [vmem:[%s1114_s17 + $0x68] sm:$0xff] %v909_v18   ;;  %v480_v21 = vpop.f32.mrf.mxu2  ;;  %v500_v22 = vpop.f32.mrf.mxu3 }
  0xd1   : > { %v442_v23 = vpop.f32.mrf.mxu0  ;;  %v462_v24 = vpop.f32.mrf.mxu1  ;;  %v481_v34 = vadd.f32 %v1103_v26, %v480_v21  ;;  %v501_v35 = vadd.f32 %v1103_v26, %v500_v22 }
  0xd2   : > { %v443_v25 = vadd.f32 %v1103_v26, %v442_v23  ;;  %v463_v27 = vadd.f32 %v1103_v26, %v462_v24 }
  0xd3   : > { %v530_v42 = vmax.f32 %v481_v34, 0.0  ;;  %v538_v43 = vmax.f32 %v501_v35, 0.0 }
  0xd4   : > { %v515_v30 = vmax.f32 %v443_v25, 0.0  ;;  %v523_v31 = vmax.f32 %v463_v27, 0.0 }
  0xd6   : > { %v854_v32 = vpack.c.bf16 %v515_v30, %v514_v28  ;;  %v874_v33 = vpack.c.bf16 %v523_v31, %v522_v29 }
  0xd8   : > { %922 = vst [vmem:[%s1114_s17 + $0x10] sm:$0xff] %v854_v32   ;;  %v482_v36 = vpop.f32.mrf.mxu2  ;;  %v502_v37 = vpop.f32.mrf.mxu3 }
  0xd9   : > { %926 = vst [vmem:[%s1114_s17 + $0x30] sm:$0xff] %v874_v33   ;;  %v483_v38 = vadd.f32 %v1103_v26, %v482_v36  ;;  %v503_v39 = vadd.f32 %v1103_v26, %v502_v37  ;;  %v445_v40 = vpop.f32.mrf.mxu0  ;;  %v465_v41 = vpop.f32.mrf.mxu1 }
  0xda   : > { %v446_v48 = vadd.f32 %v1103_v26, %v445_v40  ;;  %v466_v49 = vadd.f32 %v1103_v26, %v465_v41 }
  0xdb   : > { %v531_v44 = vmax.f32 %v483_v38, 0.0  ;;  %v539_v45 = vmax.f32 %v503_v39, 0.0 }
  0xdc   : > { %v516_v56 = vmax.f32 %v446_v48, 0.0  ;;  %v524_v57 = vmax.f32 %v466_v49, 0.0 }
  0xdd   : > { %v894_v46 = vpack.c.bf16 %v531_v44, %v530_v42  ;;  %v914_v47 = vpack.c.bf16 %v539_v45, %v538_v43 }
  0xdf   : > { %930 = vst [vmem:[%s1114_s17 + $0x50] sm:$0xff] %v894_v46  }
  0xe0   : > { %934 = vst [vmem:[%s1114_s17 + $0x70] sm:$0xff] %v914_v47   ;;  %v485_v50 = vpop.f32.mrf.mxu2  ;;  %v505_v51 = vpop.f32.mrf.mxu3 }
  0xe1   : > { %v447_v52 = vpop.f32.mrf.mxu0  ;;  %v467_v53 = vpop.f32.mrf.mxu1  ;;  %v486_v62 = vadd.f32 %v1103_v26, %v485_v50  ;;  %v506_v63 = vadd.f32 %v1103_v26, %v505_v51 }
  0xe2   : > { %v448_v54 = vadd.f32 %v1103_v26, %v447_v52  ;;  %v468_v55 = vadd.f32 %v1103_v26, %v467_v53 }
  0xe3   : > { %v532_v4 = vmax.f32 %v486_v62, 0.0  ;;  %v540_v5 = vmax.f32 %v506_v63, 0.0 }
  0xe4   : > { %v517_v58 = vmax.f32 %v448_v54, 0.0  ;;  %v525_v59 = vmax.f32 %v468_v55, 0.0 }
  0xe6   : > { %v859_v60 = vpack.c.bf16 %v517_v58, %v516_v56  ;;  %v879_v61 = vpack.c.bf16 %v525_v59, %v524_v57 }
  0xe8   : > { %923 = vst [vmem:[%s1114_s17 + $0x18] sm:$0xff] %v859_v60   ;;  %v487_v0 = vpop.f32.mrf.mxu2  ;;  %v507_v1 = vpop.f32.mrf.mxu3 }
  0xe9   : > { %927 = vst [vmem:[%s1114_s17 + $0x38] sm:$0xff] %v879_v61   ;;  %v488_v2 = vadd.f32 %v1103_v26, %v487_v0  ;;  %v508_v3 = vadd.f32 %v1103_v26, %v507_v1 }
  0xeb   : > { %v533_v6 = vmax.f32 %v488_v2, 0.0  ;;  %v541_v7 = vmax.f32 %v508_v3, 0.0 }
  0xed   : > { %v899_v8 = vpack.c.bf16 %v533_v6, %v532_v4  ;;  %v919_v9 = vpack.c.bf16 %v541_v7, %v540_v5 }
  0xef   : > { %931 = vst [vmem:[%s1114_s17 + $0x58] sm:$0xff] %v899_v8  }
  0xf0   : > { %935 = vst [vmem:[%s1114_s17 + $0x78] sm:$0xff] %v919_v9  }
  0xf1 PF: > { %s13_s14 = sadd.s32 1, %s1007_s14   ;;  %s1173_s12 = smov %s1003_s13 }
  0xf2   : > { %p10_p5 = scmp.ge.s32.totalorder %s13_s14, 4   ;;  %s1174_s13 = smov %s1176_s15 }
  0xf4   :  { %12 = sbr.rel (!%p10_p5) target bundleno = 2 (0x2), region = 68 }

// kernel: forward.14
= control target key start
LH: loop header
LB: loop body
LE: loop exit
PB: predicated region body
PF: predicated region fallthrough
CT: control target
= control target key end

     0   :  { %s669_s12 = smov 0   ;;  %s671_s13 = smov 0   ;;  %s739_s0 = inlined_call_operand.vmem [shape: bf16[128,128], index: 0, kind: input, shape index: {}]   ;;  %s740_s1 = inlined_call_operand.vmem [shape: bf16[128,128], index: 1, kind: input, shape index: {}]   ;;  %s741_s2 = inlined_call_operand.vmem [shape: f32[1,128], index: 2, kind: input, shape index: {}]   ;;  %s742_s3 = inlined_call_operand.vmem [shape: bf16[128,128], index: 3, kind: output, shape index: {}]  }
   0x1   :  { %s673_s14 = smov 0  }
   0x2 LB: > { %s22_s15 = sadd.s32 1, %s643_s13  ;;  %p486_p0 = scmp.ge.s32.totalorder %s647_s14, 1  ;;  %s647_s14 = sphi %s673_s14, %s13_s14   ;;  %s643_s13 = sphi %s671_s13, %s744_s13   ;;  %s639_s12 = sphi %s669_s12, %s743_s12  }
   0x3   : > { %p23_p1 = scmp.ge.s32.totalorder %s22_s15, 2  ;;  %p169_p2 = scmp.lt.s32.totalorder %s647_s14, 3 }
   0x5   : > { %s746_s15 = smov (%p23_p1, %s22_s15), 0  ;;  %p170_p3 = pnand %p486_p0, %p169_p2 }
   0x6   : > { %s487_s24 = sshll.u32 (!%p170_p3), %s639_s12, 3 }
   0x7   : > { %173 = sbr.rel (%p170_p3) target bundleno = 193 (0xc1), region = 32  ;;  %p204_p4 = scmp.lt.s32.totalorder (!%p170_p3), %s487_s24, 15 }
   0xc   : > { %v552_v0 = vld [vmem:[%s740_s1 + $0x38] sm:$0xff]  ;;  %v551_v1 = vld [vmem:[%s740_s1 + $0x30] sm:$0xff]  ;;  %v550_v2 = vld [vmem:[%s740_s1 + $0x28] sm:$0xff]  ;;  %s748_s24 = smov (!%p204_p4, %s487_s24), 15 }
   0xd   : > { %325 = vmatpush.bf16.msra.mxu0 %v552_v0  ;;  %576 = vmatpush.bf16.msra.mxu1 %v552_v0  ;;  %v549_v3 = vld [vmem:[%s740_s1 + $0x20] sm:$0xff]  ;;  %v548_v4 = vld [vmem:[%s740_s1 + $0x18] sm:$0xff]  ;;  %v547_v5 = vld [vmem:[%s740_s1 + $0x10] sm:$0xff]  ;;  %s488_s4 = sshll.u32 %s748_s24, 2 }
   0xe   : > { %577 = vmatpush.bf16.msra.mxu2 %v552_v0  ;;  %578 = vmatpush.bf16.msra.mxu3 %v552_v0  ;;  %v546_v6 = vld [vmem:[%s740_s1 + $0x8] sm:$0xff]  ;;  %v545_v7 = vld [vmem:[%s740_s1] sm:$0xff]  ;;  %s207_s9 = scalar_lea.vmem %s739_s0, %s488_s4  ;;  %s223_s17 = scalar_lea.vmem %s742_s3, %s488_s4 }
   0xf   : > { %v541_v8 = vld [vmem:[%s207_s9] sm:$0xff]  ;;  %v542_v9 = vld [vmem:[%s207_s9 + $0x8] sm:$0xff]  ;;  %v543_v10 = vld [vmem:[%s207_s9 + $0x10] sm:$0xff] }
  0x10   : > { %v544_v11 = vld [vmem:[%s207_s9 + $0x18] sm:$0xff]  ;;  %v624_v14 = vld [vmem:[%s741_s2] ss:$0 sm:$0xff] }
  0x11   : > { %326 = vmatpush.bf16.msra.mxu0 %v551_v1  ;;  %579 = vmatpush.bf16.msra.mxu1 %v551_v1 }
  0x12   : > { %580 = vmatpush.bf16.msra.mxu2 %v551_v1  ;;  %581 = vmatpush.bf16.msra.mxu3 %v551_v1 }
  0x15   : > { %327 = vmatpush.bf16.msra.mxu0 %v550_v2  ;;  %582 = vmatpush.bf16.msra.mxu1 %v550_v2 }
  0x16   : > { %583 = vmatpush.bf16.msra.mxu2 %v550_v2  ;;  %584 = vmatpush.bf16.msra.mxu3 %v550_v2 }
  0x19   : > { %328 = vmatpush.bf16.msra.mxu0 %v549_v3  ;;  %585 = vmatpush.bf16.msra.mxu1 %v549_v3 }
  0x1a   : > { %586 = vmatpush.bf16.msra.mxu2 %v549_v3  ;;  %587 = vmatpush.bf16.msra.mxu3 %v549_v3 }
  0x1d   : > { %329 = vmatpush.bf16.msra.mxu0 %v548_v4  ;;  %588 = vmatpush.bf16.msra.mxu1 %v548_v4 }
  0x1e   : > { %589 = vmatpush.bf16.msra.mxu2 %v548_v4  ;;  %590 = vmatpush.bf16.msra.mxu3 %v548_v4 }
  0x21   : > { %330 = vmatpush.bf16.msra.mxu0 %v547_v5  ;;  %591 = vmatpush.bf16.msra.mxu1 %v547_v5 }
  0x22   : > { %592 = vmatpush.bf16.msra.mxu2 %v547_v5  ;;  %593 = vmatpush.bf16.msra.mxu3 %v547_v5 }
  0x25   : > { %331 = vmatpush.bf16.msra.mxu0 %v546_v6  ;;  %594 = vmatpush.bf16.msra.mxu1 %v546_v6 }
  0x26   : > { %595 = vmatpush.bf16.msra.mxu2 %v546_v6  ;;  %596 = vmatpush.bf16.msra.mxu3 %v546_v6 }
  0x29   : > { %332 = vmatpush.bf16.msra.mxu0 %v545_v7  ;;  %597 = vmatpush.bf16.msra.mxu1 %v545_v7 }
  0x2a   : > { %598 = vmatpush.bf16.msra.mxu2 %v545_v7  ;;  %599 = vmatpush.bf16.msra.mxu3 %v545_v7 }
  0x2c   : > { %333 = vmatmul.bf16.vlgmr.msra.gmra.mxu0 %v541_v8  ;;  %338 = vmatmul.bf16.vlgmr.msra.gmra.mxu1 %v542_v9 }
  0x2d   : > { %343 = vmatmul.bf16.vlgmr.msra.gmra.mxu2 %v543_v10  ;;  %348 = vmatmul.bf16.vlgmr.msra.gmra.mxu3 %v544_v11 }
  0xa9   : > { %v334_v12 = vpop.f32.mrf.mxu0  ;;  %v339_v13 = vpop.f32.mrf.mxu1 }
  0xaa   : > { %v335_v15 = vadd.f32 %v624_v14, %v334_v12  ;;  %v340_v16 = vadd.f32 %v624_v14, %v339_v13 }
  0xac   : > { %v354_v23 = vmax.f32 %v335_v15, 0.0  ;;  %v356_v24 = vmax.f32 %v340_v16, 0.0 }
  0xb0   : > { %v344_v17 = vpop.f32.mrf.mxu2  ;;  %v349_v18 = vpop.f32.mrf.mxu3 }
  0xb1   : > { %v336_v19 = vpop.f32.mrf.mxu0  ;;  %v341_v20 = vpop.f32.mrf.mxu1  ;;  %v345_v29 = vadd.f32 %v624_v14, %v344_v17  ;;  %v350_v30 = vadd.f32 %v624_v14, %v349_v18 }
  0xb2   : > { %v337_v21 = vadd.f32 %v624_v14, %v336_v19  ;;  %v342_v22 = vadd.f32 %v624_v14, %v341_v20 }
  0xb3   : > { %v358_v35 = vmax.f32 %v345_v29, 0.0  ;;  %v360_v36 = vmax.f32 %v350_v30, 0.0 }
  0xb4   : > { %v355_v25 = vmax.f32 %v337_v21, 0.0  ;;  %v357_v26 = vmax.f32 %v342_v22, 0.0 }
  0xb6   : > { %v556_v27 = vpack.c.bf16 %v355_v25, %v354_v23  ;;  %v561_v28 = vpack.c.bf16 %v357_v26, %v356_v24 }
  0xb8   : > { %557 = vst [vmem:[%s223_s17] sm:$0xff] %v556_v27   ;;  %v346_v31 = vpop.f32.mrf.mxu2  ;;  %v351_v32 = vpop.f32.mrf.mxu3 }
  0xb9   : > { %573 = vst [vmem:[%s223_s17 + $0x8] sm:$0xff] %v561_v28   ;;  %v347_v33 = vadd.f32 %v624_v14, %v346_v31  ;;  %v352_v34 = vadd.f32 %v624_v14, %v351_v32 }
  0xbb   : > { %v359_v37 = vmax.f32 %v347_v33, 0.0  ;;  %v361_v38 = vmax.f32 %v352_v34, 0.0 }
  0xbd   : > { %v566_v39 = vpack.c.bf16 %v359_v37, %v358_v35  ;;  %v571_v40 = vpack.c.bf16 %v361_v38, %v360_v36 }
  0xbf   : > { %574 = vst [vmem:[%s223_s17 + $0x10] sm:$0xff] %v566_v39  }
  0xc0   : > { %575 = vst [vmem:[%s223_s17 + $0x18] sm:$0xff] %v571_v40  }
  0xc1 PF: > { %s13_s14 = sadd.s32 1, %s647_s14   ;;  %s743_s12 = smov %s643_s13 }
  0xc2   : > { %p10_p5 = scmp.ge.s32.totalorder %s13_s14, 4   ;;  %s744_s13 = smov %s746_s15 }
  0xc4   :  { %12 = sbr.rel (!%p10_p5) target bundleno = 2 (0x2), region = 68 }

// kernel: forward.13
= control target key start
LH: loop header
LB: loop body
LE: loop exit
PB: predicated region body
PF: predicated region fallthrough
CT: control target
= control target key end

     0   :  { %s758_s12 = smov 0   ;;  %s760_s13 = smov 0   ;;  %s907_s0 = inlined_call_operand.vmem [shape: bf16[128,128], index: 0, kind: input, shape index: {}]   ;;  %s908_s1 = inlined_call_operand.vmem [shape: bf16[128,256], index: 1, kind: input, shape index: {}]   ;;  %s909_s2 = inlined_call_operand.vmem [shape: f32[1,256], index: 2, kind: input, shape index: {}]   ;;  %s910_s3 = inlined_call_operand.vmem [shape: bf16[128,256], index: 3, kind: output, shape index: {}]  }
   0x1   :  { %s762_s14 = smov 0  }
   0x2 LB: > { %s22_s15 = sadd.s32 1, %s732_s13  ;;  %p565_p0 = scmp.ge.s32.totalorder %s736_s14, 1  ;;  %s736_s14 = sphi %s762_s14, %s13_s14   ;;  %s732_s13 = sphi %s760_s13, %s912_s13   ;;  %s728_s12 = sphi %s758_s12, %s911_s12  }
   0x3   : > { %p23_p1 = scmp.ge.s32.totalorder %s22_s15, 2  ;;  %p173_p2 = scmp.lt.s32.totalorder %s736_s14, 3 }
   0x5   : > { %s914_s15 = smov (%p23_p1, %s22_s15), 0  ;;  %p174_p3 = pnand %p565_p0, %p173_p2 }
   0x6   : > { %s566_s6 = sshll.u32 (!%p174_p3), %s728_s12, 3 }
   0x7   : > { %177 = sbr.rel (%p174_p3) target bundleno = 208 (0xd0), region = 32  ;;  %p212_p4 = scmp.lt.s32.totalorder (!%p174_p3), %s566_s6, 15 }
   0xc   : > { %v645_v0 = vld [vmem:[%s908_s1 + $0x70] sm:$0xf]  ;;  %v673_v1 = vld [vmem:[%s908_s1 + $0x74] sm:$0xf0]  ;;  %v672_v2 = vld [vmem:[%s908_s1 + $0x74] sm:$0xf] }
   0xd   : > { %v646_v3 = vor.u32 %v673_v1, %v645_v0  ;;  %v647_v4 = vld [vmem:[%s908_s1 + $0x78] sm:$0xf0]  ;;  %v637_v5 = vld [vmem:[%s908_s1 + $0x60] sm:$0xf]  ;;  %v671_v6 = vld [vmem:[%s908_s1 + $0x64] sm:$0xf0] }
   0xe   : > { %v650_v7 = vor.u32 %v672_v2, %v647_v4  ;;  %v670_v8 = vld [vmem:[%s908_s1 + $0x64] sm:$0xf]  ;;  %v639_v9 = vld [vmem:[%s908_s1 + $0x68] sm:$0xf0]  ;;  %v638_v10 = vor.u32 %v671_v6, %v637_v5  ;;  %v629_v12 = vld [vmem:[%s908_s1 + $0x50] sm:$0xf] }
   0xf   : > { %374 = vmatpush.bf16.msra.mxu0 %v646_v3  ;;  %674 = vmatpush.bf16.msra.mxu2 %v646_v3  ;;  %v642_v11 = vor.u32 %v670_v8, %v639_v9  ;;  %v669_v13 = vld [vmem:[%s908_s1 + $0x54] sm:$0xf0]  ;;  %v668_v14 = vld [vmem:[%s908_s1 + $0x54] sm:$0xf]  ;;  %v631_v15 = vld [vmem:[%s908_s1 + $0x58] sm:$0xf0] }
  0x10   : > { %403 = vmatpush.bf16.msra.mxu1 %v650_v7  ;;  %682 = vmatpush.bf16.msra.mxu3 %v650_v7  ;;  %v630_v16 = vor.u32 %v669_v13, %v629_v12  ;;  %v634_v17 = vor.u32 %v668_v14, %v631_v15  ;;  %v621_v18 = vld [vmem:[%s908_s1 + $0x40] sm:$0xf]  ;;  %v667_v19 = vld [vmem:[%s908_s1 + $0x44] sm:$0xf0]  ;;  %v666_v20 = vld [vmem:[%s908_s1 + $0x44] sm:$0xf] }
  0x11   : > { %v623_v21 = vld [vmem:[%s908_s1 + $0x48] sm:$0xf0]  ;;  %v622_v22 = vor.u32 %v667_v19, %v621_v18  ;;  %v613_v24 = vld [vmem:[%s908_s1 + $0x30] sm:$0xf]  ;;  %v665_v25 = vld [vmem:[%s908_s1 + $0x34] sm:$0xf0] }
  0x12   : > { %v626_v23 = vor.u32 %v666_v20, %v623_v21  ;;  %v664_v26 = vld [vmem:[%s908_s1 + $0x34] sm:$0xf]  ;;  %v615_v27 = vld [vmem:[%s908_s1 + $0x38] sm:$0xf0]  ;;  %v614_v28 = vor.u32 %v665_v25, %v613_v24  ;;  %v605_v30 = vld [vmem:[%s908_s1 + $0x20] sm:$0xf] }
  0x13   : > { %375 = vmatpush.bf16.msra.mxu0 %v638_v10  ;;  %675 = vmatpush.bf16.msra.mxu2 %v638_v10  ;;  %v618_v29 = vor.u32 %v664_v26, %v615_v27  ;;  %v663_v31 = vld [vmem:[%s908_s1 + $0x24] sm:$0xf0]  ;;  %v662_v32 = vld [vmem:[%s908_s1 + $0x24] sm:$0xf]  ;;  %v607_v33 = vld [vmem:[%s908_s1 + $0x28] sm:$0xf0] }
  0x14   : > { %404 = vmatpush.bf16.msra.mxu1 %v642_v11  ;;  %683 = vmatpush.bf16.msra.mxu3 %v642_v11  ;;  %v606_v34 = vor.u32 %v663_v31, %v605_v30  ;;  %v610_v35 = vor.u32 %v662_v32, %v607_v33  ;;  %v597_v36 = vld [vmem:[%s908_s1 + $0x10] sm:$0xf]  ;;  %v661_v37 = vld [vmem:[%s908_s1 + $0x14] sm:$0xf0]  ;;  %s916_s6 = smov (!%p212_p4, %s566_s6), 15 }
  0x15   : > { %v660_v38 = vld [vmem:[%s908_s1 + $0x14] sm:$0xf]  ;;  %v599_v39 = vld [vmem:[%s908_s1 + $0x18] sm:$0xf0]  ;;  %v598_v40 = vor.u32 %v661_v37, %v597_v36  ;;  %v589_v42 = vld [vmem:[%s908_s1] sm:$0xf] }
  0x16   : > { %v602_v41 = vor.u32 %v660_v38, %v599_v39  ;;  %v659_v43 = vld [vmem:[%s908_s1 + $0x4] sm:$0xf0]  ;;  %s567_s30 = sshll.u32 %s916_s6, 2  ;;  %v658_v44 = vld [vmem:[%s908_s1 + $0x4] sm:$0xf]  ;;  %s653_s17 = sshll.u32 %s916_s6, 3 }
  0x17   : > { %376 = vmatpush.bf16.msra.mxu0 %v630_v16  ;;  %676 = vmatpush.bf16.msra.mxu2 %v630_v16  ;;  %v591_v45 = vld [vmem:[%s908_s1 + $0x8] sm:$0xf0]  ;;  %v590_v46 = vor.u32 %v659_v43, %v589_v42  ;;  %s215_s11 = scalar_lea.vmem %s907_s0, %s567_s30  ;;  %v264_v52 = vld [vmem:[%s909_s2] sm:$0x3]  ;;  %s888_s20 = scalar_lea.vmem %s910_s3, %s653_s17 }
  0x18   : > { %405 = vmatpush.bf16.msra.mxu1 %v634_v17  ;;  %684 = vmatpush.bf16.msra.mxu3 %v634_v17  ;;  %v594_v47 = vor.u32 %v658_v44, %v591_v45  ;;  %v654_v48 = vld [vmem:[%s215_s11] sm:$0xff]  ;;  %v656_v49 = vld [vmem:[%s215_s11 + $0x10] sm:$0xff]  ;;  %v655_v50 = vld [vmem:[%s215_s11 + $0x8] sm:$0xff]  ;;  %v266_v53 = vperm.slane %v264_v52, 0  ;;  %v267_v54 = vperm.slane %v264_v52, 1 }
  0x19   : > { %v657_v51 = vld [vmem:[%s215_s11 + $0x18] sm:$0xff] }
  0x1b   : > { %377 = vmatpush.bf16.msra.mxu0 %v622_v22  ;;  %677 = vmatpush.bf16.msra.mxu2 %v622_v22 }
  0x1c   : > { %406 = vmatpush.bf16.msra.mxu1 %v626_v23  ;;  %685 = vmatpush.bf16.msra.mxu3 %v626_v23 }
  0x1f   : > { %378 = vmatpush.bf16.msra.mxu0 %v614_v28  ;;  %678 = vmatpush.bf16.msra.mxu2 %v614_v28 }
  0x20   : > { %407 = vmatpush.bf16.msra.mxu1 %v618_v29  ;;  %686 = vmatpush.bf16.msra.mxu3 %v618_v29 }
  0x23   : > { %379 = vmatpush.bf16.msra.mxu0 %v606_v34  ;;  %679 = vmatpush.bf16.msra.mxu2 %v606_v34 }
  0x24   : > { %408 = vmatpush.bf16.msra.mxu1 %v610_v35  ;;  %687 = vmatpush.bf16.msra.mxu3 %v610_v35 }
  0x27   : > { %380 = vmatpush.bf16.msra.mxu0 %v598_v40  ;;  %680 = vmatpush.bf16.msra.mxu2 %v598_v40 }
  0x28   : > { %409 = vmatpush.bf16.msra.mxu1 %v602_v41  ;;  %688 = vmatpush.bf16.msra.mxu3 %v602_v41 }
  0x2b   : > { %381 = vmatpush.bf16.msra.mxu0 %v590_v46  ;;  %681 = vmatpush.bf16.msra.mxu2 %v590_v46 }
  0x2c   : > { %410 = vmatpush.bf16.msra.mxu1 %v594_v47  ;;  %689 = vmatpush.bf16.msra.mxu3 %v594_v47 }
  0x2e   : > { %382 = vmatmul.bf16.vlgmr.msra.gmra.mxu0 %v654_v48  ;;  %392 = vmatmul.bf16.vlgmr.msra.gmra.mxu2 %v656_v49 }
  0x2f   : > { %411 = vmatmul.bf16.vlgmr.msra.gmra.mxu1 %v654_v48  ;;  %421 = vmatmul.bf16.vlgmr.msra.gmra.mxu3 %v656_v49 }
  0x3e   : > { %387 = vmatmul.bf16.gmra.mxu0 %v655_v50  ;;  %397 = vmatmul.bf16.gmra.mxu2 %v657_v51 }
  0x3f   : > { %416 = vmatmul.bf16.gmra.mxu1 %v655_v50  ;;  %426 = vmatmul.bf16.gmra.mxu3 %v657_v51 }
  0xab   : > { %v383_v55 = vpop.f32.mrf.mxu0 }
  0xac   : > { %v384_v56 = vadd.f32 %v383_v55, %v266_v53  ;;  %v412_v57 = vpop.f32.mrf.mxu1 }
  0xad   : > { %v413_v58 = vadd.f32 %v412_v57, %v267_v54 }
  0xaf   : > { %v432_v59 = vpack.c.bf16 %v413_v58, %v384_v56 }
  0xb1   : > { %440 = vst [vmem:[%s888_s20] sm:$0xff] %v432_v59  ;;  %v393_v60 = vpop.f32.mrf.mxu2 }
  0xb2   : > { %v394_v61 = vadd.f32 %v393_v60, %v266_v53  ;;  %v422_v62 = vpop.f32.mrf.mxu3 }
  0xb3   : > { %v423_v63 = vadd.f32 %v422_v62, %v267_v54  ;;  %v385_v0 = vpop.f32.mrf.mxu0 }
  0xb4   : > { %v386_v1 = vadd.f32 %v385_v0, %v266_v53  ;;  %v414_v2 = vpop.f32.mrf.mxu1 }
  0xb5   : > { %v436_v3 = vpack.c.bf16 %v423_v63, %v394_v61  ;;  %v415_v4 = vadd.f32 %v414_v2, %v267_v54 }
  0xb7   : > { %444 = vst [vmem:[%s888_s20 + $0x20] sm:$0xff] %v436_v3  ;;  %v433_v5 = vpack.c.bf16 %v415_v4, %v386_v1 }
  0xb9   : > { %441 = vst [vmem:[%s888_s20 + $0x8] sm:$0xff] %v433_v5  ;;  %v395_v6 = vpop.f32.mrf.mxu2 }
  0xba   : > { %v396_v7 = vadd.f32 %v395_v6, %v266_v53  ;;  %v424_v8 = vpop.f32.mrf.mxu3 }
  0xbb   : > { %v425_v9 = vadd.f32 %v424_v8, %v267_v54  ;;  %v388_v10 = vpop.f32.mrf.mxu0 }
  0xbc   : > { %v389_v11 = vadd.f32 %v388_v10, %v266_v53  ;;  %v417_v12 = vpop.f32.mrf.mxu1 }
  0xbd   : > { %v437_v13 = vpack.c.bf16 %v425_v9, %v396_v7  ;;  %v418_v14 = vadd.f32 %v417_v12, %v267_v54 }
  0xbf   : > { %445 = vst [vmem:[%s888_s20 + $0x28] sm:$0xff] %v437_v13  ;;  %v434_v15 = vpack.c.bf16 %v418_v14, %v389_v11 }
  0xc1   : > { %442 = vst [vmem:[%s888_s20 + $0x10] sm:$0xff] %v434_v15  ;;  %v398_v16 = vpop.f32.mrf.mxu2 }
  0xc2   : > { %v399_v17 = vadd.f32 %v398_v16, %v266_v53  ;;  %v427_v18 = vpop.f32.mrf.mxu3 }
  0xc3   : > { %v428_v19 = vadd.f32 %v427_v18, %v267_v54  ;;  %v390_v20 = vpop.f32.mrf.mxu0 }
  0xc4   : > { %v391_v21 = vadd.f32 %v390_v20, %v266_v53  ;;  %v419_v22 = vpop.f32.mrf.mxu1 }
  0xc5   : > { %v438_v23 = vpack.c.bf16 %v428_v19, %v399_v17  ;;  %v420_v24 = vadd.f32 %v419_v22, %v267_v54 }
  0xc7   : > { %446 = vst [vmem:[%s888_s20 + $0x30] sm:$0xff] %v438_v23  ;;  %v435_v25 = vpack.c.bf16 %v420_v24, %v391_v21 }
  0xc9   : > { %443 = vst [vmem:[%s888_s20 + $0x18] sm:$0xff] %v435_v25  ;;  %v400_v26 = vpop.f32.mrf.mxu2 }
  0xca   : > { %v401_v27 = vadd.f32 %v400_v26, %v266_v53  ;;  %v429_v28 = vpop.f32.mrf.mxu3 }
  0xcb   : > { %v430_v29 = vadd.f32 %v429_v28, %v267_v54 }
  0xcd   : > { %v439_v30 = vpack.c.bf16 %v430_v29, %v401_v27 }
  0xcf   : > { %447 = vst [vmem:[%s888_s20 + $0x38] sm:$0xff] %v439_v30 }
  0xd0 PF: > { %s13_s14 = sadd.s32 1, %s736_s14   ;;  %s911_s12 = smov %s732_s13 }
  0xd1   : > { %p10_p5 = scmp.ge.s32.totalorder %s13_s14, 4   ;;  %s912_s13 = smov %s914_s15 }
  0xd3   :  { %12 = sbr.rel (!%p10_p5) target bundleno = 2 (0x2), region = 68 }

// kernel: forward.15
= control target key start
LH: loop header
LB: loop body
LE: loop exit
PB: predicated region body
PF: predicated region fallthrough
CT: control target
= control target key end

     0   :  { %s1373_s12 = smov 0   ;;  %s1375_s13 = smov 0   ;;  %s1600_s0 = inlined_call_operand.vmem [shape: bf16[128,640], index: 0, kind: input, shape index: {}]   ;;  %s1601_s1 = inlined_call_operand.vmem [shape: bf16[640,128], index: 1, kind: input, shape index: {}]   ;;  %s1602_s2 = inlined_call_operand.vmem [shape: f32[1,128], index: 2, kind: input, shape index: {}]   ;;  %s1603_s3 = inlined_call_operand.vmem [shape: bf16[128,128], index: 3, kind: output, shape index: {}]  }
   0x1   :  { %s1377_s14 = smov 0  }
   0x2 LB: > { %s22_s15 = sadd.s32 1, %s1347_s13  ;;  %p957_p0 = scmp.ge.s32.totalorder %s1351_s14, 1  ;;  %s1351_s14 = sphi %s1377_s14, %s13_s14   ;;  %s1347_s13 = sphi %s1375_s13, %s1605_s13   ;;  %s1343_s12 = sphi %s1373_s12, %s1604_s12  }
   0x3   : > { %p23_p1 = scmp.ge.s32.totalorder %s22_s15, 2  ;;  %p170_p2 = scmp.lt.s32.totalorder %s1351_s14, 3 }
   0x5   : > { %s1607_s15 = smov (%p23_p1, %s22_s15), 0  ;;  %p171_p3 = pnand %p957_p0, %p170_p2 }
   0x6   : > { %s958_s5 = sshll.u32 (!%p171_p3), %s1343_s12, 3 }
   0x7   : > { %174 = sbr.rel (%p171_p3) target bundleno = 271 (0x10f), region = 32  ;;  %p206_p4 = scmp.lt.s32.totalorder (!%p171_p3), %s958_s5, 15 }
   0xc   : > { %v1231_v0 = vld [vmem:[%s1601_s1 + $0x38] sm:$0xff]  ;;  %v1230_v2 = vld [vmem:[%s1601_s1 + $0x30] sm:$0xff]  ;;  %v1229_v6 = vld [vmem:[%s1601_s1 + $0x28] sm:$0xff]  ;;  %s1609_s5 = smov (!%p206_p4, %s958_s5), 15 }
   0xd   : > { %v1247_v1 = vld [vmem:[%s1601_s1 + $0xb8] sm:$0xff]  ;;  %1287 = vmatpush.bf16.msra.mxu1 %v1231_v0  ;;  %680 = vmatpush.bf16.msra.mxu0 %v1231_v0  ;;  %v1246_v3 = vld [vmem:[%s1601_s1 + $0xb0] sm:$0xff]  ;;  %v1245_v7 = vld [vmem:[%s1601_s1 + $0xa8] sm:$0xff]  ;;  %s1303_s25 = smul.u32 20, %s1609_s5 }
   0xe   : > { %738 = vmatpush.bf16.msra.mxu2 %v1247_v1  ;;  %v1255_v4 = vld [vmem:[%s1601_s1 + $0xf8] sm:$0xff]  ;;  %v1254_v5 = vld [vmem:[%s1601_s1 + $0xf0] sm:$0xff]  ;;  %v1253_v8 = vld [vmem:[%s1601_s1 + $0xe8] sm:$0xff] }
   0xf   : > { %767 = vmatpush.bf16.msra.mxu3 %v1255_v4  ;;  %v1228_v9 = vld [vmem:[%s1601_s1 + $0x20] sm:$0xff]  ;;  %v1227_v12 = vld [vmem:[%s1601_s1 + $0x18] sm:$0xff]  ;;  %v1226_v15 = vld [vmem:[%s1601_s1 + $0x10] sm:$0xff]  ;;  %s1457_s8 = scalar_lea.vmem %s1600_s0, %s1303_s25 }
  0x10   : > { %v1244_v10 = vld [vmem:[%s1601_s1 + $0xa0] sm:$0xff]  ;;  %v1243_v13 = vld [vmem:[%s1601_s1 + $0x98] sm:$0xff]  ;;  %v1242_v16 = vld [vmem:[%s1601_s1 + $0x90] sm:$0xff] }
  0x11   : > { %1288 = vmatpush.bf16.msra.mxu1 %v1230_v2  ;;  %681 = vmatpush.bf16.msra.mxu0 %v1230_v2  ;;  %v1252_v11 = vld [vmem:[%s1601_s1 + $0xe0] sm:$0xff]  ;;  %v1251_v14 = vld [vmem:[%s1601_s1 + $0xd8] sm:$0xff]  ;;  %v1250_v17 = vld [vmem:[%s1601_s1 + $0xd0] sm:$0xff] }
  0x12   : > { %739 = vmatpush.bf16.msra.mxu2 %v1246_v3  ;;  %v1225_v18 = vld [vmem:[%s1601_s1 + $0x8] sm:$0xff]  ;;  %v1224_v20 = vld [vmem:[%s1601_s1] sm:$0xff]  ;;  %v1004_v21 = vld [vmem:[%s1457_s8 + $0x50] sm:$0xf] }
  0x13   : > { %768 = vmatpush.bf16.msra.mxu3 %v1254_v5  ;;  %v1241_v19 = vld [vmem:[%s1601_s1 + $0x88] sm:$0xff]  ;;  %v1239_v22 = vld [vmem:[%s1601_s1 + $0x78] sm:$0xff]  ;;  %v1216_v24 = vld [vmem:[%s1457_s8 + $0x60] sm:$0xf0] }
  0x14   : > { %v1249_v23 = vld [vmem:[%s1601_s1 + $0xc8] sm:$0xff]  ;;  %v964_v25 = vld [vmem:[%s1457_s8] sm:$0xf]  ;;  %v1206_v26 = vld [vmem:[%s1457_s8 + $0x10] sm:$0xf0]  ;;  %v1005_v31 = vor.u32 %v1216_v24, %v1004_v21 }
  0x15   : > { %1289 = vmatpush.bf16.msra.mxu1 %v1229_v6  ;;  %682 = vmatpush.bf16.msra.mxu0 %v1229_v6  ;;  %v1240_v27 = vld [vmem:[%s1601_s1 + $0x80] sm:$0xff]  ;;  %v972_v28 = vld [vmem:[%s1457_s8 + $0x8] sm:$0xf]  ;;  %v1207_v29 = vld [vmem:[%s1457_s8 + $0x18] sm:$0xf0]  ;;  %v965_v32 = vor.u32 %v1206_v26, %v964_v25 }
  0x16   : > { %740 = vmatpush.bf16.msra.mxu2 %v1245_v7  ;;  %v1263_v30 = vld [vmem:[%s1601_s1 + $0x138] sm:$0xff]  ;;  %v973_v33 = vor.u32 %v1207_v29, %v972_v28  ;;  %v1248_v34 = vld [vmem:[%s1601_s1 + $0xc0] sm:$0xff]  ;;  %v1205_v35 = vld [vmem:[%s1457_s8 + $0xc] sm:$0xf] }
  0x17   : > { %769 = vmatpush.bf16.msra.mxu3 %v1253_v8  ;;  %v974_v36 = vld [vmem:[%s1457_s8 + $0x1c] sm:$0xf0]  ;;  %v1238_v37 = vld [vmem:[%s1601_s1 + $0x70] sm:$0xff]  ;;  %v1237_v40 = vld [vmem:[%s1601_s1 + $0x68] sm:$0xff] }
  0x18   : > { %v1262_v38 = vld [vmem:[%s1601_s1 + $0x130] sm:$0xff]  ;;  %v977_v39 = vor.u32 %v1205_v35, %v974_v36  ;;  %v1261_v41 = vld [vmem:[%s1601_s1 + $0x128] sm:$0xff]  ;;  %v1236_v42 = vld [vmem:[%s1601_s1 + $0x60] sm:$0xff] }
  0x19   : > { %1290 = vmatpush.bf16.msra.mxu1 %v1228_v9  ;;  %683 = vmatpush.bf16.msra.mxu0 %v1228_v9  ;;  %v1260_v43 = vld [vmem:[%s1601_s1 + $0x120] sm:$0xff]  ;;  %v1024_v44 = vld [vmem:[%s1457_s8 + $0x78] sm:$0xf]  ;;  %v1221_v45 = vld [vmem:[%s1457_s8 + $0x88] sm:$0xf0] }
  0x1a   : > { %741 = vmatpush.bf16.msra.mxu2 %v1244_v10  ;;  %v984_v46 = vld [vmem:[%s1457_s8 + $0x28] sm:$0xf]  ;;  %v1211_v47 = vld [vmem:[%s1457_s8 + $0x38] sm:$0xf0]  ;;  %v992_v49 = vld [vmem:[%s1457_s8 + $0x30] sm:$0xf]  ;;  %v1025_v52 = vor.u32 %v1221_v45, %v1024_v44 }
  0x1b   : > { %770 = vmatpush.bf16.msra.mxu3 %v1252_v11  ;;  %v1235_v48 = vld [vmem:[%s1601_s1 + $0x58] sm:$0xff]  ;;  %v1212_v50 = vld [vmem:[%s1457_s8 + $0x40] sm:$0xf0]  ;;  %v985_v53 = vor.u32 %v1211_v47, %v984_v46  ;;  %v1210_v55 = vld [vmem:[%s1457_s8 + $0x34] sm:$0xf] }
  0x1c   : > { %v1259_v51 = vld [vmem:[%s1601_s1 + $0x118] sm:$0xff]  ;;  %v993_v54 = vor.u32 %v1212_v50, %v992_v49  ;;  %v994_v56 = vld [vmem:[%s1457_s8 + $0x44] sm:$0xf0]  ;;  %v1234_v57 = vld [vmem:[%s1601_s1 + $0x50] sm:$0xff] }
  0x1d   : > { %1291 = vmatpush.bf16.msra.mxu1 %v1227_v12  ;;  %684 = vmatpush.bf16.msra.mxu0 %v1227_v12  ;;  %v1258_v58 = vld [vmem:[%s1601_s1 + $0x110] sm:$0xff]  ;;  %v997_v59 = vor.u32 %v1210_v55, %v994_v56  ;;  %v1233_v60 = vld [vmem:[%s1601_s1 + $0x48] sm:$0xff]  ;;  %v1232_v62 = vld [vmem:[%s1601_s1 + $0x40] sm:$0xff] }
  0x1e   : > { %742 = vmatpush.bf16.msra.mxu2 %v1243_v13  ;;  %v1257_v61 = vld [vmem:[%s1601_s1 + $0x108] sm:$0xff]  ;;  %v1256_v63 = vld [vmem:[%s1601_s1 + $0x100] sm:$0xff]  ;;  %v966_v1 = vld [vmem:[%s1457_s8 + $0x14] sm:$0xf0] }
  0x1f   : > { %771 = vmatpush.bf16.msra.mxu3 %v1251_v14  ;;  %v1204_v0 = vld [vmem:[%s1457_s8 + $0x4] sm:$0xf]  ;;  %v980_v2 = vld [vmem:[%s1457_s8 + $0x10] sm:$0xf]  ;;  %v1012_v4 = vld [vmem:[%s1457_s8 + $0x58] sm:$0xf] }
  0x20   : > { %v1208_v3 = vld [vmem:[%s1457_s8 + $0x20] sm:$0xf0]  ;;  %v1217_v5 = vld [vmem:[%s1457_s8 + $0x68] sm:$0xf0]  ;;  %v969_v6 = vor.u32 %v1204_v0, %v966_v1  ;;  %v1215_v9 = vld [vmem:[%s1457_s8 + $0x5c] sm:$0xf] }
  0x21   : > { %1292 = vmatpush.bf16.msra.mxu1 %v1226_v15  ;;  %685 = vmatpush.bf16.msra.mxu0 %v1226_v15  ;;  %v981_v7 = vor.u32 %v1208_v3, %v980_v2  ;;  %v1013_v8 = vor.u32 %v1217_v5, %v1012_v4  ;;  %v1014_v10 = vld [vmem:[%s1457_s8 + $0x6c] sm:$0xf0]  ;;  %v1209_v12 = vld [vmem:[%s1457_s8 + $0x2c] sm:$0xf]  ;;  %v986_v13 = vld [vmem:[%s1457_s8 + $0x3c] sm:$0xf0] }
  0x22   : > { %743 = vmatpush.bf16.msra.mxu2 %v1242_v16  ;;  %v1017_v11 = vor.u32 %v1215_v9, %v1014_v10  ;;  %v1000_v14 = vld [vmem:[%s1457_s8 + $0x38] sm:$0xf]  ;;  %v1213_v15 = vld [vmem:[%s1457_s8 + $0x48] sm:$0xf0]  ;;  %v1032_v16 = vld [vmem:[%s1457_s8 + $0x80] sm:$0xf] }
  0x23   : > { %772 = vmatpush.bf16.msra.mxu3 %v1250_v17  ;;  %v1222_v17 = vld [vmem:[%s1457_s8 + $0x90] sm:$0xf0]  ;;  %v1220_v21 = vld [vmem:[%s1457_s8 + $0x84] sm:$0xf]  ;;  %v1006_v25 = vld [vmem:[%s1457_s8 + $0x64] sm:$0xf0] }
  0x24   : > { %v1214_v24 = vld [vmem:[%s1457_s8 + $0x54] sm:$0xf]  ;;  %v1020_v26 = vld [vmem:[%s1457_s8 + $0x60] sm:$0xf]  ;;  %v1040_v28 = vld [vmem:[%s1457_s8 + $0x88] sm:$0xf] }
  0x25   : > { %1293 = vmatpush.bf16.msra.mxu1 %v1225_v18  ;;  %686 = vmatpush.bf16.msra.mxu0 %v1225_v18  ;;  %v989_v18 = vor.u32 %v1209_v12, %v986_v13  ;;  %v1223_v29 = vld [vmem:[%s1457_s8 + $0x98] sm:$0xf0] }
  0x26   : > { %744 = vmatpush.bf16.msra.mxu2 %v1241_v19  ;;  %v1001_v19 = vor.u32 %v1213_v15, %v1000_v14 }
  0x27   : > { %773 = vmatpush.bf16.msra.mxu3 %v1249_v23 }
  0x29   : > { %1294 = vmatpush.bf16.msra.mxu1 %v1224_v20  ;;  %687 = vmatpush.bf16.msra.mxu0 %v1224_v20  ;;  %v1033_v20 = vor.u32 %v1222_v17, %v1032_v16 }
  0x2a   : > { %745 = vmatpush.bf16.msra.mxu2 %v1240_v27  ;;  %v1218_v27 = vld [vmem:[%s1457_s8 + $0x70] sm:$0xf0] }
  0x2b   : > { %774 = vmatpush.bf16.msra.mxu3 %v1248_v34  ;;  %v1026_v34 = vld [vmem:[%s1457_s8 + $0x8c] sm:$0xf0] }
  0x2c   : > { %698 = vmatmul.bf16.vlgmr.msra.gmra.mxu1 %v1005_v31  ;;  %688 = vmatmul.bf16.vlgmr.msra.gmra.mxu0 %v965_v32  ;;  %v1021_v31 = vor.u32 %v1218_v27, %v1020_v26  ;;  %v1041_v32 = vor.u32 %v1223_v29, %v1040_v28 }
  0x2d   : > { %709 = vmatpush.bf16.msrb.mxu1 %v1239_v22  ;;  %796 = vmatpush.bf16.msrb.mxu0 %v1263_v30  ;;  %v1034_v22 = vld [vmem:[%s1457_s8 + $0x94] sm:$0xf0] }
  0x2e   : > { %1295 = vmatpush.bf16.msrb.mxu2 %v1263_v30  ;;  %775 = vmatmul.bf16.vlgmr.msra.gmra.mxu3 %v977_v39  ;;  %v1037_v23 = vor.u32 %v1220_v21, %v1034_v22  ;;  %v1009_v30 = vor.u32 %v1214_v24, %v1006_v25 }
  0x2f   : > { %746 = vmatmul.bf16.vlgmr.msra.gmra.mxu2 %v973_v33  ;;  %v1219_v33 = vld [vmem:[%s1457_s8 + $0x7c] sm:$0xf]  ;;  %s961_s8 = sshll.u32 %s1609_s5, 2 }
  0x30   : > { %v1029_v35 = vor.u32 %v1219_v33, %v1026_v34  ;;  %s1578_s11 = scalar_lea.vmem %s1603_s3, %s961_s8 }
  0x31   : > { %710 = vmatpush.bf16.msrb.mxu1 %v1238_v37  ;;  %797 = vmatpush.bf16.msrb.mxu0 %v1262_v38 }
  0x32   : > { %1296 = vmatpush.bf16.msrb.mxu2 %v1262_v38 }
  0x35   : > { %711 = vmatpush.bf16.msrb.mxu1 %v1237_v40  ;;  %798 = vmatpush.bf16.msrb.mxu0 %v1261_v41 }
  0x36   : > { %1297 = vmatpush.bf16.msrb.mxu2 %v1261_v41 }
  0x39   : > { %712 = vmatpush.bf16.msrb.mxu1 %v1236_v42  ;;  %799 = vmatpush.bf16.msrb.mxu0 %v1260_v43 }
  0x3a   : > { %1298 = vmatpush.bf16.msrb.mxu2 %v1260_v43 }
  0x3c   : > { %703 = vmatmul.bf16.gmra.mxu1 %v1025_v52  ;;  %693 = vmatmul.bf16.gmra.mxu0 %v985_v53 }
  0x3d   : > { %713 = vmatpush.bf16.msrb.mxu1 %v1235_v48  ;;  %800 = vmatpush.bf16.msrb.mxu0 %v1259_v51  ;;  %v1569_v48 = vld [vmem:[%s1602_s2] ss:$0 sm:$0xff] }
  0x3e   : > { %1299 = vmatpush.bf16.msrb.mxu2 %v1259_v51  ;;  %780 = vmatmul.bf16.gmra.mxu3 %v997_v59 }
  0x3f   : > { %751 = vmatmul.bf16.gmra.mxu2 %v993_v54 }
  0x41   : > { %714 = vmatpush.bf16.msrb.mxu1 %v1234_v57  ;;  %801 = vmatpush.bf16.msrb.mxu0 %v1258_v58 }
  0x42   : > { %1300 = vmatpush.bf16.msrb.mxu2 %v1258_v58 }
  0x45   : > { %715 = vmatpush.bf16.msrb.mxu1 %v1233_v60  ;;  %802 = vmatpush.bf16.msrb.mxu0 %v1257_v61 }
  0x46   : > { %1301 = vmatpush.bf16.msrb.mxu2 %v1257_v61 }
  0x49   : > { %716 = vmatpush.bf16.msrb.mxu1 %v1232_v62  ;;  %803 = vmatpush.bf16.msrb.mxu0 %v1256_v63 }
  0x4a   : > { %1302 = vmatpush.bf16.msrb.mxu2 %v1256_v63 }
  0x4c   : > { %717 = vmatmul.bf16.vlgmr.msrb.gmra.mxu1 %v969_v6  ;;  %804 = vmatmul.bf16.vlgmr.msrb.gmra.mxu0 %v981_v7 }
  0x4e   : > { %785 = vmatmul.bf16.gmra.mxu3 %v1017_v11 }
  0x4f   : > { %756 = vmatmul.bf16.gmra.mxu2 %v1013_v8 }
  0x5c   : > { %722 = vmatmul.bf16.gmra.mxu1 %v989_v18  ;;  %809 = vmatmul.bf16.gmra.mxu0 %v1001_v19 }
  0x5e   : > { %790 = vmatmul.bf16.gmra.mxu3 %v1037_v23 }
  0x5f   : > { %761 = vmatmul.bf16.gmra.mxu2 %v1033_v20 }
  0x6c   : > { %727 = vmatmul.bf16.gmra.mxu1 %v1009_v30  ;;  %814 = vmatmul.bf16.gmra.mxu0 %v1021_v31 }
  0x6f   : > { %819 = vmatmul.bf16.vlgmr.msrb.gmra.mxu2 %v1041_v32 }
  0x7c   : > { %732 = vmatmul.bf16.gmra.mxu1 %v1029_v35 }
  0xa9   : > { %v699_v36 = vpop.f32.mrf.mxu1  ;;  %v689_v37 = vpop.f32.mrf.mxu0 }
  0xaa   : > { %v690_v49 = vadd.f32 %v1569_v48, %v689_v37  ;;  %v700_v22 = vadd.f32 %v1569_v48, %v699_v36 }
  0xb1   : > { %v701_v39 = vpop.f32.mrf.mxu1  ;;  %v691_v40 = vpop.f32.mrf.mxu0 }
  0xb2   : > { %v747_v38 = vpop.f32.mrf.mxu2  ;;  %v776_v44 = vpop.f32.mrf.mxu3  ;;  %v692_v56 = vadd.f32 %v1569_v48, %v691_v40  ;;  %v702_v32 = vadd.f32 %v1569_v48, %v701_v39 }
  0xb9   : > { %v1562_v42 = vpop.f32.mrf.mxu1  ;;  %v694_v43 = vpop.f32.mrf.mxu0 }
  0xba   : > { %v749_v41 = vpop.f32.mrf.mxu2  ;;  %v778_v50 = vpop.f32.mrf.mxu3  ;;  %v695_v2 = vadd.f32 %v1569_v48, %v694_v43 }
  0xc1   : > { %v1564_v46 = vpop.f32.mrf.mxu1  ;;  %v696_v47 = vpop.f32.mrf.mxu0 }
  0xc2   : > { %v752_v45 = vpop.f32.mrf.mxu2  ;;  %v781_v61 = vpop.f32.mrf.mxu3  ;;  %v697_v13 = vadd.f32 %v1569_v48, %v696_v47 }
  0xc9   : > { %v718_v51 = vpop.f32.mrf.mxu1  ;;  %v805_v52 = vpop.f32.mrf.mxu0 }
  0xca   : > { %v719_v53 = vadd.f32 %v718_v51, %v690_v49  ;;  %v754_v54 = vpop.f32.mrf.mxu2  ;;  %v783_v10 = vpop.f32.mrf.mxu3 }
  0xcc   : > { %v748_v55 = vadd.f32 %v747_v38, %v719_v53 }
  0xce   : > { %v777_v59 = vadd.f32 %v776_v44, %v748_v55  ;;  %v705_v44 = vadd.f32 %v1569_v48, %v1562_v42  ;;  %v707_v55 = vadd.f32 %v1569_v48, %v1564_v46 }
  0xd0   : > { %v806_v0 = vadd.f32 %v805_v52, %v777_v59 }
  0xd1   : > { %v720_v57 = vpop.f32.mrf.mxu1  ;;  %v807_v58 = vpop.f32.mrf.mxu0 }
  0xd2   : > { %v721_v60 = vadd.f32 %v720_v57, %v692_v56  ;;  %v757_v63 = vpop.f32.mrf.mxu2  ;;  %v825_v6 = vmax.f32 %v806_v0, 0.0  ;;  %v786_v21 = vpop.f32.mrf.mxu3 }
  0xd4   : > { %v750_v62 = vadd.f32 %v749_v41, %v721_v60 }
  0xd6   : > { %v779_v1 = vadd.f32 %v778_v50, %v750_v62 }
  0xd8   : > { %v808_v3 = vadd.f32 %v807_v58, %v779_v1 }
  0xd9   : > { %v723_v4 = vpop.f32.mrf.mxu1  ;;  %v810_v5 = vpop.f32.mrf.mxu0 }
  0xda   : > { %v826_v7 = vmax.f32 %v808_v3, 0.0  ;;  %v724_v8 = vadd.f32 %v723_v4, %v695_v2  ;;  %v759_v12 = vpop.f32.mrf.mxu2  ;;  %v788_v33 = vpop.f32.mrf.mxu3 }
  0xdc   : > { %v1267_v9 = vpack.c.bf16 %v826_v7, %v825_v6  ;;  %v753_v11 = vadd.f32 %v752_v45, %v724_v8 }
  0xde   : > { %1268 = vst [vmem:[%s1578_s11] sm:$0xff] %v1267_v9   ;;  %v782_v16 = vadd.f32 %v781_v61, %v753_v11 }
  0xe0   : > { %v811_v19 = vadd.f32 %v810_v5, %v782_v16 }
  0xe1   : > { %v725_v14 = vpop.f32.mrf.mxu1  ;;  %v812_v15 = vpop.f32.mrf.mxu0 }
  0xe2   : > { %v726_v17 = vadd.f32 %v725_v14, %v697_v13  ;;  %v762_v24 = vpop.f32.mrf.mxu2  ;;  %v827_v26 = vmax.f32 %v811_v19, 0.0  ;;  %v791_v52 = vpop.f32.mrf.mxu3 }
  0xe4   : > { %v755_v18 = vadd.f32 %v754_v54, %v726_v17 }
  0xe6   : > { %v784_v20 = vadd.f32 %v783_v10, %v755_v18 }
  0xe8   : > { %v813_v23 = vadd.f32 %v812_v15, %v784_v20 }
  0xe9   : > { %v728_v25 = vpop.f32.mrf.mxu1  ;;  %v815_v29 = vpop.f32.mrf.mxu0 }
  0xea   : > { %v828_v27 = vmax.f32 %v813_v23, 0.0  ;;  %v729_v28 = vadd.f32 %v728_v25, %v700_v22  ;;  %v764_v38 = vpop.f32.mrf.mxu2  ;;  %v793_v60 = vpop.f32.mrf.mxu3 }
  0xec   : > { %v1272_v30 = vpack.c.bf16 %v828_v27, %v827_v26  ;;  %v758_v31 = vadd.f32 %v757_v63, %v729_v28 }
  0xee   : > { %1284 = vst [vmem:[%s1578_s11 + $0x8] sm:$0xff] %v1272_v30   ;;  %v787_v35 = vadd.f32 %v786_v21, %v758_v31 }
  0xf0   : > { %v816_v41 = vadd.f32 %v815_v29, %v787_v35 }
  0xf1   : > { %v730_v34 = vpop.f32.mrf.mxu1  ;;  %v817_v36 = vpop.f32.mrf.mxu0 }
  0xf2   : > { %v731_v37 = vadd.f32 %v730_v34, %v702_v32  ;;  %v829_v49 = vmax.f32 %v816_v41, 0.0  ;;  %v820_v53 = vpop.f32.mrf.mxu2 }
  0xf4   : > { %v760_v40 = vadd.f32 %v759_v12, %v731_v37 }
  0xf6   : > { %v789_v43 = vadd.f32 %v788_v33, %v760_v40 }
  0xf8   : > { %v818_v45 = vadd.f32 %v817_v36, %v789_v43 }
  0xf9   : > { %v733_v47 = vpop.f32.mrf.mxu1 }
  0xfa   : > { %v830_v50 = vmax.f32 %v818_v45, 0.0  ;;  %v734_v51 = vadd.f32 %v733_v47, %v705_v44  ;;  %v822_v62 = vpop.f32.mrf.mxu2 }
  0xfc   : > { %v1277_v39 = vpack.c.bf16 %v830_v50, %v829_v49  ;;  %v763_v54 = vadd.f32 %v762_v24, %v734_v51 }
  0xfe   : > { %1285 = vst [vmem:[%s1578_s11 + $0x10] sm:$0xff] %v1277_v39   ;;  %v792_v57 = vadd.f32 %v791_v52, %v763_v54 }
 0x100   : > { %v821_v42 = vadd.f32 %v820_v53, %v792_v57 }
 0x101   : > { %v735_v56 = vpop.f32.mrf.mxu1 }
 0x102   : > { %v736_v58 = vadd.f32 %v735_v56, %v707_v55  ;;  %v831_v0 = vmax.f32 %v821_v42, 0.0 }
 0x104   : > { %v765_v59 = vadd.f32 %v764_v38, %v736_v58 }
 0x106   : > { %v794_v61 = vadd.f32 %v793_v60, %v765_v59 }
 0x108   : > { %v823_v63 = vadd.f32 %v822_v62, %v794_v61 }
 0x10a   : > { %v832_v1 = vmax.f32 %v823_v63, 0.0 }
 0x10c   : > { %v1282_v2 = vpack.c.bf16 %v832_v1, %v831_v0 }
 0x10e   : > { %1286 = vst [vmem:[%s1578_s11 + $0x18] sm:$0xff] %v1282_v2  }
 0x10f PF: > { %s13_s14 = sadd.s32 1, %s1351_s14   ;;  %s1604_s12 = smov %s1347_s13 }
 0x110   : > { %p10_p5 = scmp.ge.s32.totalorder %s13_s14, 4   ;;  %s1605_s13 = smov %s1607_s15 }
 0x112   :  { %12 = sbr.rel (!%p10_p5) target bundleno = 2 (0x2), region = 68 }

// kernel: forward.16
= control target key start
LH: loop header
LB: loop body
LE: loop exit
PB: predicated region body
PF: predicated region fallthrough
CT: control target
= control target key end

     0   :  { %s909_s15 = smov 0   ;;  %s911_s16 = smov 0   ;;  %s1091_s0 = inlined_call_operand.vmem [shape: bf16[128,128], index: 0, kind: input, shape index: {}]   ;;  %s1092_s1 = inlined_call_operand.vmem [shape: bf16[128,256], index: 1, kind: input, shape index: {}]   ;;  %s1093_s2 = inlined_call_operand.vmem [shape: f32[1,256], index: 2, kind: input, shape index: {}]   ;;  %s1094_s3 = inlined_call_operand.vmem [shape: bf16[128,256], index: 3, kind: input, shape index: {}]   ;;  %s1095_s4 = inlined_call_operand.vmem [shape: bf16[128,256], index: 4, kind: output, shape index: {}]  }
   0x1   :  { %s913_s17 = smov 0  }
   0x2 LB: > { %s23_s18 = sadd.s32 1, %s878_s16  ;;  %p707_p0 = scmp.ge.s32.totalorder %s882_s17, 1  ;;  %s882_s17 = sphi %s913_s17, %s14_s17   ;;  %s878_s16 = sphi %s911_s16, %s1097_s16   ;;  %s874_s15 = sphi %s909_s15, %s1096_s15  }
   0x3   : > { %p24_p1 = scmp.ge.s32.totalorder %s23_s18, 2  ;;  %p217_p2 = scmp.lt.s32.totalorder %s882_s17, 3 }
   0x5   : > { %s1099_s18 = smov (%p24_p1, %s23_s18), 0  ;;  %p218_p3 = pnand %p707_p0, %p217_p2 }
   0x6   : > { %s708_s11 = sshll.u32 (!%p218_p3), %s874_s15, 3 }
   0x7   : > { %221 = sbr.rel (%p218_p3) target bundleno = 212 (0xd4), region = 36  ;;  %p268_p4 = scmp.lt.s32.totalorder (!%p218_p3), %s708_s11, 15 }
   0xc   : > { %v790_v0 = vld [vmem:[%s1092_s1 + $0x70] sm:$0xf]  ;;  %v819_v1 = vld [vmem:[%s1092_s1 + $0x74] sm:$0xf0]  ;;  %v818_v2 = vld [vmem:[%s1092_s1 + $0x74] sm:$0xf] }
   0xd   : > { %v791_v3 = vor.u32 %v819_v1, %v790_v0  ;;  %v792_v4 = vld [vmem:[%s1092_s1 + $0x78] sm:$0xf0]  ;;  %v782_v5 = vld [vmem:[%s1092_s1 + $0x60] sm:$0xf]  ;;  %v817_v6 = vld [vmem:[%s1092_s1 + $0x64] sm:$0xf0] }
   0xe   : > { %v795_v7 = vor.u32 %v818_v2, %v792_v4  ;;  %v816_v8 = vld [vmem:[%s1092_s1 + $0x64] sm:$0xf]  ;;  %v784_v9 = vld [vmem:[%s1092_s1 + $0x68] sm:$0xf0]  ;;  %v783_v10 = vor.u32 %v817_v6, %v782_v5  ;;  %v774_v12 = vld [vmem:[%s1092_s1 + $0x50] sm:$0xf] }
   0xf   : > { %442 = vmatpush.bf16.msra.mxu0 %v791_v3  ;;  %820 = vmatpush.bf16.msra.mxu2 %v791_v3  ;;  %v787_v11 = vor.u32 %v816_v8, %v784_v9  ;;  %v815_v13 = vld [vmem:[%s1092_s1 + $0x54] sm:$0xf0]  ;;  %v814_v14 = vld [vmem:[%s1092_s1 + $0x54] sm:$0xf]  ;;  %v776_v15 = vld [vmem:[%s1092_s1 + $0x58] sm:$0xf0] }
  0x10   : > { %471 = vmatpush.bf16.msra.mxu1 %v795_v7  ;;  %828 = vmatpush.bf16.msra.mxu3 %v795_v7  ;;  %v775_v16 = vor.u32 %v815_v13, %v774_v12  ;;  %v779_v17 = vor.u32 %v814_v14, %v776_v15  ;;  %v766_v18 = vld [vmem:[%s1092_s1 + $0x40] sm:$0xf]  ;;  %v813_v19 = vld [vmem:[%s1092_s1 + $0x44] sm:$0xf0]  ;;  %v812_v20 = vld [vmem:[%s1092_s1 + $0x44] sm:$0xf] }
  0x11   : > { %v768_v21 = vld [vmem:[%s1092_s1 + $0x48] sm:$0xf0]  ;;  %v767_v22 = vor.u32 %v813_v19, %v766_v18  ;;  %v758_v24 = vld [vmem:[%s1092_s1 + $0x30] sm:$0xf]  ;;  %v811_v25 = vld [vmem:[%s1092_s1 + $0x34] sm:$0xf0] }
  0x12   : > { %v771_v23 = vor.u32 %v812_v20, %v768_v21  ;;  %v810_v26 = vld [vmem:[%s1092_s1 + $0x34] sm:$0xf]  ;;  %v760_v27 = vld [vmem:[%s1092_s1 + $0x38] sm:$0xf0]  ;;  %v759_v28 = vor.u32 %v811_v25, %v758_v24  ;;  %v750_v30 = vld [vmem:[%s1092_s1 + $0x20] sm:$0xf] }
  0x13   : > { %443 = vmatpush.bf16.msra.mxu0 %v783_v10  ;;  %821 = vmatpush.bf16.msra.mxu2 %v783_v10  ;;  %v763_v29 = vor.u32 %v810_v26, %v760_v27  ;;  %v809_v31 = vld [vmem:[%s1092_s1 + $0x24] sm:$0xf0]  ;;  %v808_v32 = vld [vmem:[%s1092_s1 + $0x24] sm:$0xf]  ;;  %v752_v33 = vld [vmem:[%s1092_s1 + $0x28] sm:$0xf0] }
  0x14   : > { %472 = vmatpush.bf16.msra.mxu1 %v787_v11  ;;  %829 = vmatpush.bf16.msra.mxu3 %v787_v11  ;;  %v751_v34 = vor.u32 %v809_v31, %v750_v30  ;;  %v755_v35 = vor.u32 %v808_v32, %v752_v33  ;;  %v742_v36 = vld [vmem:[%s1092_s1 + $0x10] sm:$0xf]  ;;  %v807_v37 = vld [vmem:[%s1092_s1 + $0x14] sm:$0xf0]  ;;  %s1101_s11 = smov (!%p268_p4, %s708_s11), 15 }
  0x15   : > { %v806_v38 = vld [vmem:[%s1092_s1 + $0x14] sm:$0xf]  ;;  %v744_v39 = vld [vmem:[%s1092_s1 + $0x18] sm:$0xf0]  ;;  %v743_v40 = vor.u32 %v807_v37, %v742_v36  ;;  %v734_v42 = vld [vmem:[%s1092_s1] sm:$0xf] }
  0x16   : > { %v747_v41 = vor.u32 %v806_v38, %v744_v39  ;;  %v805_v43 = vld [vmem:[%s1092_s1 + $0x4] sm:$0xf0]  ;;  %s709_s9 = sshll.u32 %s1101_s11, 2  ;;  %v804_v44 = vld [vmem:[%s1092_s1 + $0x4] sm:$0xf]  ;;  %s798_s15 = sshll.u32 %s1101_s11, 3 }
  0x17   : > { %444 = vmatpush.bf16.msra.mxu0 %v775_v16  ;;  %822 = vmatpush.bf16.msra.mxu2 %v775_v16  ;;  %v736_v45 = vld [vmem:[%s1092_s1 + $0x8] sm:$0xf0]  ;;  %v735_v46 = vor.u32 %v805_v43, %v734_v42  ;;  %s271_s21 = scalar_lea.vmem %s1091_s0, %s709_s9  ;;  %s1036_s24 = scalar_lea.vmem %s1094_s3, %s798_s15  ;;  %v332_v52 = vld [vmem:[%s1093_s2] sm:$0x3] }
  0x18   : > { %473 = vmatpush.bf16.msra.mxu1 %v779_v17  ;;  %830 = vmatpush.bf16.msra.mxu3 %v779_v17  ;;  %v739_v47 = vor.u32 %v804_v44, %v736_v45  ;;  %v800_v48 = vld [vmem:[%s271_s21] sm:$0xff]  ;;  %v802_v49 = vld [vmem:[%s271_s21 + $0x10] sm:$0xff]  ;;  %v801_v50 = vld [vmem:[%s271_s21 + $0x8] sm:$0xff]  ;;  %v1042_v54 = vperm.slane %v332_v52, 0  ;;  %v1044_v55 = vperm.slane %v332_v52, 1  ;;  %s1053_s28 = scalar_lea.vmem %s1095_s4, %s798_s15 }
  0x19   : > { %v803_v51 = vld [vmem:[%s271_s21 + $0x18] sm:$0xff]  ;;  %v500_v53 = vld [vmem:[%s1036_s24] sm:$0xff]  ;;  %v501_v1 = vld [vmem:[%s1036_s24 + $0x8] sm:$0xff] }
  0x1a   : > { %v508_v56 = vunpack.c.l.bf16 %v500_v53  ;;  %v509_v58 = vunpack.c.h.bf16 %v500_v53  ;;  %v504_v62 = vld [vmem:[%s1036_s24 + $0x20] sm:$0xff]  ;;  %v510_v9 = vunpack.c.l.bf16 %v501_v1  ;;  %v511_v13 = vunpack.c.h.bf16 %v501_v1  ;;  %v505_v19 = vld [vmem:[%s1036_s24 + $0x28] sm:$0xff]  ;;  %v502_v24 = vld [vmem:[%s1036_s24 + $0x10] sm:$0xff] }
  0x1b   : > { %445 = vmatpush.bf16.msra.mxu0 %v767_v22  ;;  %823 = vmatpush.bf16.msra.mxu2 %v767_v22  ;;  %v516_v3 = vunpack.c.l.bf16 %v504_v62  ;;  %v517_v6 = vunpack.c.h.bf16 %v504_v62  ;;  %v518_v26 = vunpack.c.l.bf16 %v505_v19  ;;  %v519_v30 = vunpack.c.h.bf16 %v505_v19  ;;  %v506_v43 = vld [vmem:[%s1036_s24 + $0x30] sm:$0xff] }
  0x1c   : > { %474 = vmatpush.bf16.msra.mxu1 %v771_v23  ;;  %831 = vmatpush.bf16.msra.mxu3 %v771_v23  ;;  %v512_v33 = vunpack.c.l.bf16 %v502_v24  ;;  %v513_v37 = vunpack.c.h.bf16 %v502_v24 }
  0x1f   : > { %446 = vmatpush.bf16.msra.mxu0 %v759_v28  ;;  %824 = vmatpush.bf16.msra.mxu2 %v759_v28 }
  0x20   : > { %475 = vmatpush.bf16.msra.mxu1 %v763_v29  ;;  %832 = vmatpush.bf16.msra.mxu3 %v763_v29 }
  0x23   : > { %447 = vmatpush.bf16.msra.mxu0 %v751_v34  ;;  %825 = vmatpush.bf16.msra.mxu2 %v751_v34 }
  0x24   : > { %476 = vmatpush.bf16.msra.mxu1 %v755_v35  ;;  %833 = vmatpush.bf16.msra.mxu3 %v755_v35 }
  0x27   : > { %448 = vmatpush.bf16.msra.mxu0 %v743_v40  ;;  %826 = vmatpush.bf16.msra.mxu2 %v743_v40 }
  0x28   : > { %477 = vmatpush.bf16.msra.mxu1 %v747_v41  ;;  %834 = vmatpush.bf16.msra.mxu3 %v747_v41 }
  0x2b   : > { %449 = vmatpush.bf16.msra.mxu0 %v735_v46  ;;  %827 = vmatpush.bf16.msra.mxu2 %v735_v46 }
  0x2c   : > { %478 = vmatpush.bf16.msra.mxu1 %v739_v47  ;;  %835 = vmatpush.bf16.msra.mxu3 %v739_v47 }
  0x2e   : > { %450 = vmatmul.bf16.vlgmr.msra.gmra.mxu0 %v800_v48  ;;  %460 = vmatmul.bf16.vlgmr.msra.gmra.mxu2 %v802_v49 }
  0x2f   : > { %479 = vmatmul.bf16.vlgmr.msra.gmra.mxu1 %v800_v48  ;;  %489 = vmatmul.bf16.vlgmr.msra.gmra.mxu3 %v802_v49  ;;  %v503_v48 = vld [vmem:[%s1036_s24 + $0x18] sm:$0xff] }
  0x3e   : > { %455 = vmatmul.bf16.gmra.mxu0 %v801_v50  ;;  %465 = vmatmul.bf16.gmra.mxu2 %v803_v51 }
  0x3f   : > { %484 = vmatmul.bf16.gmra.mxu1 %v801_v50  ;;  %494 = vmatmul.bf16.gmra.mxu3 %v803_v51  ;;  %v520_v50 = vunpack.c.l.bf16 %v506_v43 }
  0xab   : > { %v451_v57 = vpop.f32.mrf.mxu0 }
  0xac   : > { %v452_v59 = vadd.f32 %v451_v57, %v1042_v54  ;;  %v480_v60 = vpop.f32.mrf.mxu1 }
  0xad   : > { %v481_v61 = vadd.f32 %v480_v60, %v1044_v55 }
  0xae   : > { %v524_v63 = vadd.f32 %v508_v56, %v452_v59  ;;  %v521_v56 = vunpack.c.h.bf16 %v506_v43  ;;  %v514_v59 = vunpack.c.l.bf16 %v503_v48 }
  0xaf   : > { %v525_v0 = vadd.f32 %v509_v58, %v481_v61 }
  0xb0   : > { %v540_v2 = vmax.f32 %v524_v63, 0.0  ;;  %v515_v63 = vunpack.c.h.bf16 %v503_v48 }
  0xb1   : > { %v541_v4 = vmax.f32 %v525_v0, 0.0  ;;  %v461_v5 = vpop.f32.mrf.mxu2 }
  0xb2   : > { %v462_v7 = vadd.f32 %v461_v5, %v1042_v54  ;;  %v490_v8 = vpop.f32.mrf.mxu3  ;;  %v507_v5 = vld [vmem:[%s1036_s24 + $0x38] sm:$0xff] }
  0xb3   : > { %v556_v10 = vpack.c.bf16 %v541_v4, %v540_v2  ;;  %v491_v11 = vadd.f32 %v490_v8, %v1044_v55  ;;  %v453_v12 = vpop.f32.mrf.mxu0 }
  0xb4   : > { %v532_v14 = vadd.f32 %v516_v3, %v462_v7  ;;  %v454_v15 = vadd.f32 %v453_v12, %v1042_v54  ;;  %v482_v16 = vpop.f32.mrf.mxu1 }
  0xb5   : > { %564 = vst [vmem:[%s1053_s28] sm:$0xff] %v556_v10  ;;  %v533_v17 = vadd.f32 %v517_v6, %v491_v11  ;;  %v483_v18 = vadd.f32 %v482_v16, %v1044_v55  ;;  %v522_v11 = vunpack.c.l.bf16 %v507_v5 }
  0xb6   : > { %v548_v20 = vmax.f32 %v532_v14, 0.0  ;;  %v526_v21 = vadd.f32 %v510_v9, %v454_v15  ;;  %v523_v15 = vunpack.c.h.bf16 %v507_v5 }
  0xb7   : > { %v549_v22 = vmax.f32 %v533_v17, 0.0  ;;  %v527_v23 = vadd.f32 %v511_v13, %v483_v18 }
  0xb8   : > { %v542_v25 = vmax.f32 %v526_v21, 0.0 }
  0xb9   : > { %v560_v27 = vpack.c.bf16 %v549_v22, %v548_v20  ;;  %v543_v28 = vmax.f32 %v527_v23, 0.0  ;;  %v463_v29 = vpop.f32.mrf.mxu2 }
  0xba   : > { %v464_v31 = vadd.f32 %v463_v29, %v1042_v54  ;;  %v492_v32 = vpop.f32.mrf.mxu3 }
  0xbb   : > { %568 = vst [vmem:[%s1053_s28 + $0x20] sm:$0xff] %v560_v27  ;;  %v557_v34 = vpack.c.bf16 %v543_v28, %v542_v25  ;;  %v493_v35 = vadd.f32 %v492_v32, %v1044_v55  ;;  %v456_v36 = vpop.f32.mrf.mxu0 }
  0xbc   : > { %v534_v38 = vadd.f32 %v518_v26, %v464_v31  ;;  %v457_v39 = vadd.f32 %v456_v36, %v1042_v54  ;;  %v485_v40 = vpop.f32.mrf.mxu1 }
  0xbd   : > { %565 = vst [vmem:[%s1053_s28 + $0x8] sm:$0xff] %v557_v34  ;;  %v535_v41 = vadd.f32 %v519_v30, %v493_v35  ;;  %v486_v42 = vadd.f32 %v485_v40, %v1044_v55 }
  0xbe   : > { %v550_v44 = vmax.f32 %v534_v38, 0.0  ;;  %v528_v45 = vadd.f32 %v512_v33, %v457_v39 }
  0xbf   : > { %v551_v46 = vmax.f32 %v535_v41, 0.0  ;;  %v529_v47 = vadd.f32 %v513_v37, %v486_v42 }
  0xc0   : > { %v544_v49 = vmax.f32 %v528_v45, 0.0 }
  0xc1   : > { %v561_v51 = vpack.c.bf16 %v551_v46, %v550_v44  ;;  %v545_v52 = vmax.f32 %v529_v47, 0.0  ;;  %v466_v53 = vpop.f32.mrf.mxu2 }
  0xc2   : > { %v467_v57 = vadd.f32 %v466_v53, %v1042_v54  ;;  %v495_v58 = vpop.f32.mrf.mxu3 }
  0xc3   : > { %569 = vst [vmem:[%s1053_s28 + $0x28] sm:$0xff] %v561_v51  ;;  %v558_v60 = vpack.c.bf16 %v545_v52, %v544_v49  ;;  %v496_v61 = vadd.f32 %v495_v58, %v1044_v55  ;;  %v458_v62 = vpop.f32.mrf.mxu0 }
  0xc4   : > { %v536_v0 = vadd.f32 %v520_v50, %v467_v57  ;;  %v459_v1 = vadd.f32 %v458_v62, %v1042_v54  ;;  %v487_v2 = vpop.f32.mrf.mxu1 }
  0xc5   : > { %566 = vst [vmem:[%s1053_s28 + $0x10] sm:$0xff] %v558_v60  ;;  %v537_v3 = vadd.f32 %v521_v56, %v496_v61  ;;  %v488_v4 = vadd.f32 %v487_v2, %v1044_v55 }
  0xc6   : > { %v552_v6 = vmax.f32 %v536_v0, 0.0  ;;  %v530_v7 = vadd.f32 %v514_v59, %v459_v1 }
  0xc7   : > { %v553_v8 = vmax.f32 %v537_v3, 0.0  ;;  %v531_v9 = vadd.f32 %v515_v63, %v488_v4 }
  0xc8   : > { %v546_v10 = vmax.f32 %v530_v7, 0.0 }
  0xc9   : > { %v562_v12 = vpack.c.bf16 %v553_v8, %v552_v6  ;;  %v547_v13 = vmax.f32 %v531_v9, 0.0  ;;  %v468_v14 = vpop.f32.mrf.mxu2 }
  0xca   : > { %v469_v16 = vadd.f32 %v468_v14, %v1042_v54  ;;  %v497_v17 = vpop.f32.mrf.mxu3 }
  0xcb   : > { %570 = vst [vmem:[%s1053_s28 + $0x30] sm:$0xff] %v562_v12  ;;  %v559_v18 = vpack.c.bf16 %v547_v13, %v546_v10  ;;  %v498_v19 = vadd.f32 %v497_v17, %v1044_v55 }
  0xcc   : > { %v538_v20 = vadd.f32 %v522_v11, %v469_v16 }
  0xcd   : > { %567 = vst [vmem:[%s1053_s28 + $0x18] sm:$0xff] %v559_v18  ;;  %v539_v21 = vadd.f32 %v523_v15, %v498_v19 }
  0xce   : > { %v554_v22 = vmax.f32 %v538_v20, 0.0 }
  0xcf   : > { %v555_v23 = vmax.f32 %v539_v21, 0.0 }
  0xd1   : > { %v563_v24 = vpack.c.bf16 %v555_v23, %v554_v22 }
  0xd3   : > { %571 = vst [vmem:[%s1053_s28 + $0x38] sm:$0xff] %v563_v24 }
  0xd4 PF: > { %s14_s17 = sadd.s32 1, %s882_s17   ;;  %s1096_s15 = smov %s878_s16 }
  0xd5   : > { %p11_p5 = scmp.ge.s32.totalorder %s14_s17, 4   ;;  %s1097_s16 = smov %s1099_s18 }
  0xd7   :  { %13 = sbr.rel (!%p11_p5) target bundleno = 2 (0x2), region = 75 }

// kernel: forward.17
= control target key start
LH: loop header
LB: loop body
LE: loop exit
PB: predicated region body
PF: predicated region fallthrough
CT: control target
= control target key end

     0   :  { %s835_s12 = smov 0   ;;  %s837_s13 = smov 0   ;;  %s950_s0 = inlined_call_operand.vmem [shape: bf16[128,256], index: 0, kind: input, shape index: {}]   ;;  %s951_s1 = inlined_call_operand.vmem [shape: bf16[256,128], index: 1, kind: input, shape index: {}]   ;;  %s952_s2 = inlined_call_operand.vmem [shape: f32[1,128], index: 2, kind: input, shape index: {}]   ;;  %s953_s3 = inlined_call_operand.vmem [shape: bf16[128,128], index: 3, kind: output, shape index: {}]  }
   0x1   :  { %s839_s14 = smov 0  }
   0x2 LB: > { %s22_s15 = sadd.s32 1, %s809_s13  ;;  %p598_p0 = scmp.ge.s32.totalorder %s813_s14, 1  ;;  %s813_s14 = sphi %s839_s14, %s13_s14   ;;  %s809_s13 = sphi %s837_s13, %s955_s13   ;;  %s805_s12 = sphi %s835_s12, %s954_s12  }
   0x3   : > { %p23_p1 = scmp.ge.s32.totalorder %s22_s15, 2  ;;  %p170_p2 = scmp.lt.s32.totalorder %s813_s14, 3 }
   0x5   : > { %s957_s15 = smov (%p23_p1, %s22_s15), 0  ;;  %p171_p3 = pnand %p598_p0, %p170_p2 }
   0x6   : > { %s599_s28 = sshll.u32 (!%p171_p3), %s805_s12, 3 }
   0x7   : > { %174 = sbr.rel (%p171_p3) target bundleno = 209 (0xd1), region = 32  ;;  %p206_p4 = scmp.lt.s32.totalorder (!%p171_p3), %s599_s28, 15 }
   0xc   : > { %v718_v0 = vld [vmem:[%s951_s1 + $0x38] sm:$0xff]  ;;  %v717_v2 = vld [vmem:[%s951_s1 + $0x30] sm:$0xff]  ;;  %v716_v4 = vld [vmem:[%s951_s1 + $0x28] sm:$0xff]  ;;  %s959_s28 = smov (!%p206_p4, %s599_s28), 15 }
   0xd   : > { %v726_v1 = vld [vmem:[%s951_s1 + $0x78] sm:$0xff]  ;;  %408 = vmatpush.bf16.msra.mxu0 %v718_v0  ;;  %750 = vmatpush.bf16.msra.mxu2 %v718_v0  ;;  %v725_v3 = vld [vmem:[%s951_s1 + $0x70] sm:$0xff]  ;;  %v724_v5 = vld [vmem:[%s951_s1 + $0x68] sm:$0xff]  ;;  %s702_s17 = sshll.u32 %s959_s28, 3  ;;  %s603_s5 = sshll.u32 %s959_s28, 2 }
   0xe   : > { %437 = vmatpush.bf16.msra.mxu1 %v726_v1  ;;  %758 = vmatpush.bf16.msra.mxu3 %v726_v1  ;;  %v715_v6 = vld [vmem:[%s951_s1 + $0x20] sm:$0xff]  ;;  %v714_v8 = vld [vmem:[%s951_s1 + $0x18] sm:$0xff]  ;;  %v713_v10 = vld [vmem:[%s951_s1 + $0x10] sm:$0xff]  ;;  %s901_s22 = scalar_lea.vmem %s950_s0, %s702_s17  ;;  %s935_s8 = scalar_lea.vmem %s953_s3, %s603_s5 }
   0xf   : > { %v723_v7 = vld [vmem:[%s951_s1 + $0x60] sm:$0xff]  ;;  %v722_v9 = vld [vmem:[%s951_s1 + $0x58] sm:$0xff]  ;;  %v721_v11 = vld [vmem:[%s951_s1 + $0x50] sm:$0xff] }
  0x10   : > { %v712_v12 = vld [vmem:[%s951_s1 + $0x8] sm:$0xff]  ;;  %v711_v14 = vld [vmem:[%s951_s1] sm:$0xff]  ;;  %v614_v28 = vld [vmem:[%s901_s22 + $0x10] sm:$0xf] }
  0x11   : > { %409 = vmatpush.bf16.msra.mxu0 %v717_v2  ;;  %751 = vmatpush.bf16.msra.mxu2 %v717_v2  ;;  %v720_v13 = vld [vmem:[%s951_s1 + $0x48] sm:$0xff]  ;;  %v719_v15 = vld [vmem:[%s951_s1 + $0x40] sm:$0xff]  ;;  %v706_v29 = vld [vmem:[%s901_s22 + $0x14] sm:$0xf0] }
  0x12   : > { %438 = vmatpush.bf16.msra.mxu1 %v725_v3  ;;  %759 = vmatpush.bf16.msra.mxu3 %v725_v3  ;;  %v606_v16 = vld [vmem:[%s901_s22] sm:$0xf]  ;;  %v704_v17 = vld [vmem:[%s901_s22 + $0x4] sm:$0xf0]  ;;  %v703_v20 = vld [vmem:[%s901_s22 + $0x4] sm:$0xf]  ;;  %v615_v36 = vor.u32 %v706_v29, %v614_v28 }
  0x13   : > { %v622_v18 = vld [vmem:[%s901_s22 + $0x20] sm:$0xf]  ;;  %v708_v19 = vld [vmem:[%s901_s22 + $0x24] sm:$0xf0]  ;;  %v608_v21 = vld [vmem:[%s901_s22 + $0x8] sm:$0xf0]  ;;  %v607_v24 = vor.u32 %v704_v17, %v606_v16 }
  0x14   : > { %v707_v22 = vld [vmem:[%s901_s22 + $0x24] sm:$0xf]  ;;  %v624_v23 = vld [vmem:[%s901_s22 + $0x28] sm:$0xf0]  ;;  %v623_v25 = vor.u32 %v708_v19, %v622_v18  ;;  %v611_v26 = vor.u32 %v703_v20, %v608_v21  ;;  %v630_v30 = vld [vmem:[%s901_s22 + $0x30] sm:$0xf] }
  0x15   : > { %410 = vmatpush.bf16.msra.mxu0 %v716_v4  ;;  %752 = vmatpush.bf16.msra.mxu2 %v716_v4  ;;  %v627_v27 = vor.u32 %v707_v22, %v624_v23  ;;  %v710_v31 = vld [vmem:[%s901_s22 + $0x34] sm:$0xf0]  ;;  %v705_v32 = vld [vmem:[%s901_s22 + $0x14] sm:$0xf]  ;;  %v616_v33 = vld [vmem:[%s901_s22 + $0x18] sm:$0xf0] }
  0x16   : > { %439 = vmatpush.bf16.msra.mxu1 %v724_v5  ;;  %760 = vmatpush.bf16.msra.mxu3 %v724_v5  ;;  %v709_v34 = vld [vmem:[%s901_s22 + $0x34] sm:$0xf]  ;;  %v632_v35 = vld [vmem:[%s901_s22 + $0x38] sm:$0xf0]  ;;  %v631_v37 = vor.u32 %v710_v31, %v630_v30  ;;  %v619_v38 = vor.u32 %v705_v32, %v616_v33  ;;  %v790_v41 = vld [vmem:[%s952_s2] ss:$0 sm:$0xff] }
  0x17   : > { %v635_v39 = vor.u32 %v709_v34, %v632_v35 }
  0x19   : > { %411 = vmatpush.bf16.msra.mxu0 %v715_v6  ;;  %753 = vmatpush.bf16.msra.mxu2 %v715_v6 }
  0x1a   : > { %440 = vmatpush.bf16.msra.mxu1 %v723_v7  ;;  %761 = vmatpush.bf16.msra.mxu3 %v723_v7 }
  0x1d   : > { %412 = vmatpush.bf16.msra.mxu0 %v714_v8  ;;  %754 = vmatpush.bf16.msra.mxu2 %v714_v8 }
  0x1e   : > { %441 = vmatpush.bf16.msra.mxu1 %v722_v9  ;;  %762 = vmatpush.bf16.msra.mxu3 %v722_v9 }
  0x21   : > { %413 = vmatpush.bf16.msra.mxu0 %v713_v10  ;;  %755 = vmatpush.bf16.msra.mxu2 %v713_v10 }
  0x22   : > { %442 = vmatpush.bf16.msra.mxu1 %v721_v11  ;;  %763 = vmatpush.bf16.msra.mxu3 %v721_v11 }
  0x25   : > { %414 = vmatpush.bf16.msra.mxu0 %v712_v12  ;;  %756 = vmatpush.bf16.msra.mxu2 %v712_v12 }
  0x26   : > { %443 = vmatpush.bf16.msra.mxu1 %v720_v13  ;;  %764 = vmatpush.bf16.msra.mxu3 %v720_v13 }
  0x29   : > { %415 = vmatpush.bf16.msra.mxu0 %v711_v14  ;;  %757 = vmatpush.bf16.msra.mxu2 %v711_v14 }
  0x2a   : > { %444 = vmatpush.bf16.msra.mxu1 %v719_v15  ;;  %765 = vmatpush.bf16.msra.mxu3 %v719_v15 }
  0x2c   : > { %416 = vmatmul.bf16.vlgmr.msra.gmra.mxu0 %v607_v24  ;;  %426 = vmatmul.bf16.vlgmr.msra.gmra.mxu2 %v623_v25 }
  0x2d   : > { %445 = vmatmul.bf16.vlgmr.msra.gmra.mxu1 %v611_v26  ;;  %455 = vmatmul.bf16.vlgmr.msra.gmra.mxu3 %v627_v27 }
  0x3c   : > { %421 = vmatmul.bf16.gmra.mxu0 %v615_v36  ;;  %431 = vmatmul.bf16.gmra.mxu2 %v631_v37 }
  0x3d   : > { %450 = vmatmul.bf16.gmra.mxu1 %v619_v38  ;;  %460 = vmatmul.bf16.gmra.mxu3 %v635_v39 }
  0xa9   : > { %v417_v40 = vpop.f32.mrf.mxu0 }
  0xaa   : > { %v446_v42 = vpop.f32.mrf.mxu1  ;;  %v418_v43 = vadd.f32 %v790_v41, %v417_v40 }
  0xac   : > { %v447_v47 = vadd.f32 %v446_v42, %v418_v43 }
  0xae   : > { %v466_v52 = vmax.f32 %v447_v47, 0.0 }
  0xaf   : > { %v427_v44 = vpop.f32.mrf.mxu2 }
  0xb0   : > { %v456_v45 = vpop.f32.mrf.mxu3  ;;  %v428_v50 = vadd.f32 %v790_v41, %v427_v44 }
  0xb1   : > { %v419_v46 = vpop.f32.mrf.mxu0 }
  0xb2   : > { %v420_v48 = vadd.f32 %v790_v41, %v419_v46  ;;  %v448_v49 = vpop.f32.mrf.mxu1  ;;  %v457_v55 = vadd.f32 %v456_v45, %v428_v50 }
  0xb4   : > { %v449_v51 = vadd.f32 %v448_v49, %v420_v48  ;;  %v470_v62 = vmax.f32 %v457_v55, 0.0 }
  0xb6   : > { %v467_v53 = vmax.f32 %v449_v51, 0.0 }
  0xb7   : > { %v429_v54 = vpop.f32.mrf.mxu2 }
  0xb8   : > { %v730_v56 = vpack.c.bf16 %v467_v53, %v466_v52  ;;  %v430_v57 = vadd.f32 %v790_v41, %v429_v54  ;;  %v458_v58 = vpop.f32.mrf.mxu3 }
  0xb9   : > { %v422_v59 = vpop.f32.mrf.mxu0 }
  0xba   : > { %731 = vst [vmem:[%s935_s8] sm:$0xff] %v730_v56   ;;  %v459_v60 = vadd.f32 %v458_v58, %v430_v57  ;;  %v451_v61 = vpop.f32.mrf.mxu1  ;;  %v423_v1 = vadd.f32 %v790_v41, %v422_v59 }
  0xbc   : > { %v471_v63 = vmax.f32 %v459_v60, 0.0  ;;  %v452_v5 = vadd.f32 %v451_v61, %v423_v1 }
  0xbe   : > { %v740_v0 = vpack.c.bf16 %v471_v63, %v470_v62  ;;  %v468_v10 = vmax.f32 %v452_v5, 0.0 }
  0xbf   : > { %v432_v2 = vpop.f32.mrf.mxu2 }
  0xc0   : > { %748 = vst [vmem:[%s935_s8 + $0x10] sm:$0xff] %v740_v0   ;;  %v461_v3 = vpop.f32.mrf.mxu3  ;;  %v433_v8 = vadd.f32 %v790_v41, %v432_v2 }
  0xc1   : > { %v424_v4 = vpop.f32.mrf.mxu0 }
  0xc2   : > { %v425_v6 = vadd.f32 %v790_v41, %v424_v4  ;;  %v453_v7 = vpop.f32.mrf.mxu1  ;;  %v462_v13 = vadd.f32 %v461_v3, %v433_v8 }
  0xc4   : > { %v454_v9 = vadd.f32 %v453_v7, %v425_v6  ;;  %v472_v18 = vmax.f32 %v462_v13, 0.0 }
  0xc6   : > { %v469_v11 = vmax.f32 %v454_v9, 0.0 }
  0xc7   : > { %v434_v12 = vpop.f32.mrf.mxu2 }
  0xc8   : > { %v735_v14 = vpack.c.bf16 %v469_v11, %v468_v10  ;;  %v435_v15 = vadd.f32 %v790_v41, %v434_v12  ;;  %v463_v16 = vpop.f32.mrf.mxu3 }
  0xca   : > { %747 = vst [vmem:[%s935_s8 + $0x8] sm:$0xff] %v735_v14   ;;  %v464_v17 = vadd.f32 %v463_v16, %v435_v15 }
  0xcc   : > { %v473_v19 = vmax.f32 %v464_v17, 0.0 }
  0xce   : > { %v745_v20 = vpack.c.bf16 %v473_v19, %v472_v18 }
  0xd0   : > { %749 = vst [vmem:[%s935_s8 + $0x18] sm:$0xff] %v745_v20  }
  0xd1 PF: > { %s13_s14 = sadd.s32 1, %s813_s14   ;;  %s954_s12 = smov %s809_s13 }
  0xd2   : > { %p10_p5 = scmp.ge.s32.totalorder %s13_s14, 4   ;;  %s955_s13 = smov %s957_s15 }
  0xd4   :  { %12 = sbr.rel (!%p10_p5) target bundleno = 2 (0x2), region = 68 }

</bundles_post_ra>
